<compile_context>
chip_gen: v7x
topology: tpu7x:2x2x1
jax: 0.10.0
libtpu: 0.0.40
codegen_flags: <defaults>
</compile_context>

<pallas_src>
import jax
import jax.numpy as jnp
from jax.experimental import pallas as pl
from jax.experimental.pallas import tpu as pltpu

# ----------------------------- config ---------------------------------------
VOCAB = 64
MAX_POS = 32
HIDDEN = 32
N_LAYERS = 2
N_HEADS = 2
HEAD_DIM = HIDDEN // N_HEADS
FFN = 64
PAD_ID = 1          # code_inputs.ne(1) -> RoBERTa pad token id
LN_EPS = 1e-5
BATCH = 2
SEQ = 8
MATMUL_DTYPE = jnp.bfloat16   # MXU operand dtype; accumulation stays float32


# ----------------------------- in-kernel helpers -----------------------------
def _mm(x, w):
    """MXU matmul with bf16 operands and f32 accumulation."""
    return jnp.dot(x.astype(MATMUL_DTYPE), w.astype(MATMUL_DTYPE),
                   preferred_element_type=jnp.float32)


def _layernorm(x, g, b):
    mu = jnp.mean(x, axis=-1, keepdims=True)
    var = jnp.mean(jnp.square(x - mu), axis=-1, keepdims=True)
    return (x - mu) * jax.lax.rsqrt(var + LN_EPS) * g + b


# ----------------------------- fused encoder kernel --------------------------
def _encoder_kernel(
    # inputs
    emb_ref, mask_ref,
    emb_ln_g_ref, emb_ln_b_ref,
    w_qkv_ref, b_qkv_ref, w_o_ref, b_o_ref,
    ln1_g_ref, ln1_b_ref,
    w1_ref, b1_ref, w2_ref, b2_ref,
    ln2_g_ref, ln2_b_ref,
    pool_w_ref, pool_b_ref,
    # outputs
    out_ref,
    # scratch
    h_scratch,
):
    """Grid = (N_LAYERS,).  Hidden state is resident in VMEM scratch; per-layer
    weights stream in via BlockSpec (next layer prefetched while this one runs)."""
    layer = pl.program_id(0)

    # --- embedding LayerNorm: first grid step only, LN-only (no zero residual)
    @pl.when(layer == 0)
    def _():
        h_scratch[...] = _layernorm(emb_ref[...], emb_ln_g_ref[...],
                                    emb_ln_b_ref[...])

    h = h_scratch[...]                                    # (B*S, H)

    # --- fused QKV projection (1/sqrt(head_dim) folded into the Q columns) ----
    qkv = _mm(h, w_qkv_ref[0]) + b_qkv_ref[0]             # (B*S, 3H)
    q = qkv[:, 0 * HIDDEN:1 * HIDDEN]
    k = qkv[:, 1 * HIDDEN:2 * HIDDEN]
    v = qkv[:, 2 * HIDDEN:3 * HIDDEN]

    # --- multi-head attention: all (batch, head) tiles inside this invocation --
    ctx_rows = []
    for b in range(BATCH):
        r0 = b * SEQ
        maskb = mask_ref[b:b + 1, :]                      # (1, S) additive mask
        head_ctx = []
        for hd in range(N_HEADS):
            c0 = hd * HEAD_DIM
            qbh = q[r0:r0 + SEQ, c0:c0 + HEAD_DIM]        # (S, dh)
            kbh = k[r0:r0 + SEQ, c0:c0 + HEAD_DIM]
            vbh = v[r0:r0 + SEQ, c0:c0 + HEAD_DIM]
            s = _mm(qbh, kbh.T) + maskb                   # (S, S)
            s = s - jnp.max(s, axis=-1, keepdims=True)
            p = jnp.exp(s)
            p = p * pl.reciprocal(jnp.sum(p, axis=-1, keepdims=True),
                                  approx=True)            # EUP slot, ~free
            head_ctx.append(_mm(p, vbh))                  # (S, dh)
        ctx_rows.append(jnp.concatenate(head_ctx, axis=1))     # (S, H)
    ctx = jnp.concatenate(ctx_rows, axis=0)                    # (B*S, H)

    # --- output projection + residual LayerNorm (fused epilogue) --------------
    attn_out = _mm(ctx, w_o_ref[0]) + b_o_ref[0]
    h = _layernorm(attn_out + h, ln1_g_ref[0], ln1_b_ref[0])

    # --- GELU feed-forward + residual LayerNorm --------------------------------
    # TODO(synk): HF RoBERTa/CodeBERT uses exact erf GELU; tanh approximation here.
    f = jax.nn.gelu(_mm(h, w1_ref[0]) + b1_ref[0], approximate=True)
    f = _mm(f, w2_ref[0]) + b2_ref[0]
    h = _layernorm(f + h, ln2_g_ref[0], ln2_b_ref[0])

    h_scratch[...] = h

    # --- pooler + L2-normalize on the last layer --------------------------------
    @pl.when(layer == pl.num_programs(0) - 1)
    def _():
        cls = jnp.concatenate(                              # [CLS] rows, (B, H)
            [h[b * SEQ:b * SEQ + 1, :] for b in range(BATCH)], axis=0)
        pooled = jnp.tanh(_mm(cls, pool_w_ref[...]) + pool_b_ref[...])
        norm = jnp.sqrt(jnp.sum(pooled * pooled, axis=1, keepdims=True))
        out_ref[...] = pooled / jnp.maximum(norm, 1e-12)    # torch F.normalize


# ----------------------------- parameters -----------------------------------
def init_params(key):
    ks = iter(jax.random.split(key, 8 + 8 * N_LAYERS))
    dn = lambda *s: (0.02 * jax.random.normal(next(ks), s)).astype(jnp.float32)
    zeros = lambda *s: jnp.zeros(s, jnp.float32)
    ones = lambda *s: jnp.ones(s, jnp.float32)

    scale = 1.0 / (HEAD_DIM ** 0.5)
    acc = {k: [] for k in ("w_qkv", "b_qkv", "w_o", "b_o", "ln1_g", "ln1_b",
                           "w1", "b1", "w2", "b2", "ln2_g", "ln2_b")}
    for _ in range(N_LAYERS):
        wq, wk, wv = dn(HIDDEN, HIDDEN), dn(HIDDEN, HIDDEN), dn(HIDDEN, HIDDEN)
        # fold the attention 1/sqrt(head_dim) scale into the Q projection
        acc["w_qkv"].append(jnp.concatenate([wq * scale, wk, wv], axis=1))
        acc["b_qkv"].append(zeros(1, 3 * HIDDEN))
        acc["w_o"].append(dn(HIDDEN, HIDDEN)); acc["b_o"].append(zeros(1, HIDDEN))
        acc["ln1_g"].append(ones(1, HIDDEN)); acc["ln1_b"].append(zeros(1, HIDDEN))
        acc["w1"].append(dn(HIDDEN, FFN)); acc["b1"].append(zeros(1, FFN))
        acc["w2"].append(dn(FFN, HIDDEN)); acc["b2"].append(zeros(1, HIDDEN))
        acc["ln2_g"].append(ones(1, HIDDEN)); acc["ln2_b"].append(zeros(1, HIDDEN))

    stk = lambda n: jnp.stack(acc[n], axis=0)
    return {
        "word_emb": dn(VOCAB, HIDDEN),
        "pos_emb": dn(MAX_POS, HIDDEN),
        "type_emb": dn(2, HIDDEN),
        "emb_ln_g": ones(1, HIDDEN), "emb_ln_b": zeros(1, HIDDEN),
        "pool_w": dn(HIDDEN, HIDDEN).astype(MATMUL_DTYPE),
        "pool_b": zeros(1, HIDDEN),
        "w_qkv": stk("w_qkv").astype(MATMUL_DTYPE), "b_qkv": stk("b_qkv"),
        "w_o": stk("w_o").astype(MATMUL_DTYPE), "b_o": stk("b_o"),
        "ln1_g": stk("ln1_g"), "ln1_b": stk("ln1_b"),
        "w1": stk("w1").astype(MATMUL_DTYPE), "b1": stk("b1"),
        "w2": stk("w2").astype(MATMUL_DTYPE), "b2": stk("b2"),
        "ln2_g": stk("ln2_g"), "ln2_b": stk("ln2_b"),
    }


# ----------------------------- forward ---------------------------------------
def codebert_forward(params, input_ids):
    """input_ids: (B, S) int32.  Returns L2-normalized pooled output (B, H)."""
    B, S = input_ids.shape
    keep = (input_ids != PAD_ID)                                   # ids.ne(1)
    add_mask = jnp.where(keep, 0.0, -1e9).astype(jnp.float32)      # (B, S)

    # embedding gathers are XLA glue; everything else runs inside the kernel.
    # TODO(synk): RoBERTa offsets position ids by padding_idx+1 and skips pads.
    positions = jnp.arange(S)
    emb = (params["word_emb"][input_ids]
           + params["pos_emb"][positions][None, :, :]
           + params["type_emb"][0][None, None, :])
    emb2 = emb.reshape(B * S, HIDDEN).astype(jnp.float32)

    args = (emb2, add_mask,
            params["emb_ln_g"], params["emb_ln_b"],
            params["w_qkv"], params["b_qkv"], params["w_o"], params["b_o"],
            params["ln1_g"], params["ln1_b"],
            params["w1"], params["b1"], params["w2"], params["b2"],
            params["ln2_g"], params["ln2_b"],
            params["pool_w"], params["pool_b"])

    def per_layer(shape):                        # stacked (N_LAYERS, ...) weights
        return pl.BlockSpec((1,) + shape, lambda l: (l, 0, 0))

    def shared(shape):                           # same block every grid step
        nd = len(shape)
        return pl.BlockSpec(shape, lambda l, _nd=nd: (0,) * _nd)

    in_specs = [
        shared((B * S, HIDDEN)),                          # embeddings
        shared((B, S)),                                   # additive attn mask
        shared((1, HIDDEN)), shared((1, HIDDEN)),         # emb LayerNorm
        per_layer((HIDDEN, 3 * HIDDEN)), per_layer((1, 3 * HIDDEN)),
        per_layer((HIDDEN, HIDDEN)), per_layer((1, HIDDEN)),
        per_layer((1, HIDDEN)), per_layer((1, HIDDEN)),
        per_layer((HIDDEN, FFN)), per_layer((1, FFN)),
        per_layer((FFN, HIDDEN)), per_layer((1, HIDDEN)),
        per_layer((1, HIDDEN)), per_layer((1, HIDDEN)),
        shared((HIDDEN, HIDDEN)), shared((1, HIDDEN)),    # pooler
    ]

    M = B * S
    flops = N_LAYERS * (2 * M * HIDDEN * 3 * HIDDEN
                        + 4 * B * N_HEADS * S * S * HEAD_DIM
                        + 2 * M * HIDDEN * HIDDEN
                        + 4 * M * HIDDEN * FFN) + 2 * B * HIDDEN * HIDDEN
    transcendentals = N_LAYERS * (B * N_HEADS * S * S + M * FFN) + B * HIDDEN
    bytes_accessed = int(sum(a.size * a.dtype.itemsize for a in args)
                         + B * HIDDEN * 4)

    return pl.pallas_call(
        _encoder_kernel,
        out_shape=jax.ShapeDtypeStruct((B, HIDDEN), jnp.float32),
        grid_spec=pltpu.PrefetchScalarGridSpec(
            num_scalar_prefetch=0,
            grid=(N_LAYERS,),
            in_specs=in_specs,
            out_specs=pl.BlockSpec((B, HIDDEN), lambda l: (0, 0)),
            scratch_shapes=[pltpu.VMEM((B * S, HIDDEN), jnp.float32)],
        ),
        compiler_params=pltpu.CompilerParams(
            dimension_semantics=("arbitrary",)),          # sequential over layers
        cost_estimate=pl.CostEstimate(
            flops=flops, transcendentals=transcendentals,
            bytes_accessed=bytes_accessed),
    )(*args)


# ----------------------------- main ------------------------------------------
if __name__ == "__main__":
    key = jax.random.PRNGKey(0)
    k_params, k_ids = jax.random.split(key)

    params = init_params(k_params)

    # deterministic token ids in [2, VOCAB) with trailing pad (id=1) positions
    ids = jax.random.randint(k_ids, (BATCH, SEQ), 2, VOCAB, dtype=jnp.int32)
    pad_tail = jnp.arange(SEQ)[None, :] >= jnp.array([[SEQ - 2], [SEQ - 3]])
    ids = jnp.where(pad_tail, PAD_ID, ids)

    out = jax.jit(codebert_forward)(params, ids)
    out = jax.block_until_ready(out)

    assert out.shape == (BATCH, HIDDEN)
    # rows are L2-normalized
    norms = jnp.sqrt(jnp.sum(out * out, axis=1))
    assert jnp.allclose(norms, 1.0, atol=1e-5), norms
    print("KERNEL_OK")
</pallas_src>

<mosaic_0001>
module attributes {stable_mosaic.version = 11 : i64} {
  func.func @_encoder_kernel(%arg0: i32, %arg1: memref<16x32xf32, #tpu.memory_space<vmem>>, %arg2: memref<2x8xf32, #tpu.memory_space<vmem>>, %arg3: memref<1x32xf32, #tpu.memory_space<vmem>>, %arg4: memref<1x32xf32, #tpu.memory_space<vmem>>, %arg5: memref<1x32x96xbf16, #tpu.memory_space<vmem>>, %arg6: memref<1x1x96xf32, #tpu.memory_space<vmem>>, %arg7: memref<1x32x32xbf16, #tpu.memory_space<vmem>>, %arg8: memref<1x1x32xf32, #tpu.memory_space<vmem>>, %arg9: memref<1x1x32xf32, #tpu.memory_space<vmem>>, %arg10: memref<1x1x32xf32, #tpu.memory_space<vmem>>, %arg11: memref<1x32x64xbf16, #tpu.memory_space<vmem>>, %arg12: memref<1x1x64xf32, #tpu.memory_space<vmem>>, %arg13: memref<1x64x32xbf16, #tpu.memory_space<vmem>>, %arg14: memref<1x1x32xf32, #tpu.memory_space<vmem>>, %arg15: memref<1x1x32xf32, #tpu.memory_space<vmem>>, %arg16: memref<1x1x32xf32, #tpu.memory_space<vmem>>, %arg17: memref<32x32xbf16, #tpu.memory_space<vmem>>, %arg18: memref<1x32xf32, #tpu.memory_space<vmem>>, %arg19: memref<2x32xf32, #tpu.memory_space<vmem>>, %arg20: memref<16x32xf32, #tpu.memory_space<vmem>>) attributes {dimension_semantics = [#tpu.dimension_semantics<arbitrary>], iteration_bounds = array<i64: 2>, scalar_prefetch = 0 : i64, scratch_operands = 1 : i64, tpu.core_type = #tpu.core_type<tc>, window_params = [{pipeline_mode = #tpu.pipeline_mode<synchronous>, transform_indices = @transform_0, window_bounds = array<i64: 16, 32>}, {pipeline_mode = #tpu.pipeline_mode<synchronous>, transform_indices = @transform_1, window_bounds = array<i64: 2, 8>}, {pipeline_mode = #tpu.pipeline_mode<synchronous>, transform_indices = @transform_2, window_bounds = array<i64: 1, 32>}, {pipeline_mode = #tpu.pipeline_mode<synchronous>, transform_indices = @transform_3, window_bounds = array<i64: 1, 32>}, {transform_indices = @transform_4, window_bounds = array<i64: 1, 32, 96>}, {transform_indices = @transform_5, window_bounds = array<i64: 1, 1, 96>}, {transform_indices = @transform_6, window_bounds = array<i64: 1, 32, 32>}, {transform_indices = @transform_7, window_bounds = array<i64: 1, 1, 32>}, {transform_indices = @transform_8, window_bounds = array<i64: 1, 1, 32>}, {transform_indices = @transform_9, window_bounds = array<i64: 1, 1, 32>}, {transform_indices = @transform_10, window_bounds = array<i64: 1, 32, 64>}, {transform_indices = @transform_11, window_bounds = array<i64: 1, 1, 64>}, {transform_indices = @transform_12, window_bounds = array<i64: 1, 64, 32>}, {transform_indices = @transform_13, window_bounds = array<i64: 1, 1, 32>}, {transform_indices = @transform_14, window_bounds = array<i64: 1, 1, 32>}, {transform_indices = @transform_15, window_bounds = array<i64: 1, 1, 32>}, {pipeline_mode = #tpu.pipeline_mode<synchronous>, transform_indices = @transform_16, window_bounds = array<i64: 32, 32>}, {pipeline_mode = #tpu.pipeline_mode<synchronous>, transform_indices = @transform_17, window_bounds = array<i64: 1, 32>}, {pipeline_mode = #tpu.pipeline_mode<synchronous>, transform_indices = @transform_18, window_bounds = array<i64: 2, 32>}]} {
    %c0_i32 = arith.constant 0 : i32
    %0 = arith.cmpi eq, %arg0, %c0_i32 : i32
    %1 = arith.extui %0 : i1 to i32
    %c0_i32_0 = arith.constant 0 : i32
    %2 = arith.cmpi ne, %1, %c0_i32_0 : i32
    scf.if %2 {
      %c0_77 = arith.constant 0 : index
      %c0_78 = arith.constant 0 : index
      %203 = vector.load %arg1[%c0_77, %c0_78] : memref<16x32xf32, #tpu.memory_space<vmem>>, vector<16x32xf32>
      %c0_79 = arith.constant 0 : index
      %c0_80 = arith.constant 0 : index
      %204 = vector.load %arg3[%c0_79, %c0_80] : memref<1x32xf32, #tpu.memory_space<vmem>>, vector<1x32xf32>
      %c0_81 = arith.constant 0 : index
      %c0_82 = arith.constant 0 : index
      %205 = vector.load %arg4[%c0_81, %c0_82] : memref<1x32xf32, #tpu.memory_space<vmem>>, vector<1x32xf32>
      %cst_83 = arith.constant dense<0.000000e+00> : vector<16xf32>
      %206 = vector.multi_reduction <add>, %203, %cst_83 [1] : vector<16x32xf32> to vector<16xf32>
      %207 = vector.shape_cast %206 : vector<16xf32> to vector<16x1xf32>
      %cst_84 = arith.constant 3.200000e+01 : f32
      %208 = vector.broadcast %cst_84 : f32 to vector<16x1xf32>
      %209 = arith.divf %207, %208 : vector<16x1xf32>
      %210 = vector.broadcast %209 : vector<16x1xf32> to vector<16x32xf32>
      %211 = arith.subf %203, %210 : vector<16x32xf32>
      %212 = arith.mulf %211, %211 : vector<16x32xf32>
      %cst_85 = arith.constant dense<0.000000e+00> : vector<16xf32>
      %213 = vector.multi_reduction <add>, %212, %cst_85 [1] : vector<16x32xf32> to vector<16xf32>
      %214 = vector.shape_cast %213 : vector<16xf32> to vector<16x1xf32>
      %cst_86 = arith.constant 3.200000e+01 : f32
      %215 = vector.broadcast %cst_86 : f32 to vector<16x1xf32>
      %216 = arith.divf %214, %215 : vector<16x1xf32>
      %217 = vector.broadcast %209 : vector<16x1xf32> to vector<16x32xf32>
      %218 = arith.subf %203, %217 : vector<16x32xf32>
      %cst_87 = arith.constant 9.99999974E-6 : f32
      %219 = vector.broadcast %cst_87 : f32 to vector<16x1xf32>
      %220 = arith.addf %216, %219 : vector<16x1xf32>
      %221 = math.rsqrt %220 : vector<16x1xf32>
      %222 = vector.broadcast %221 : vector<16x1xf32> to vector<16x32xf32>
      %223 = arith.mulf %218, %222 : vector<16x32xf32>
      %224 = vector.broadcast %204 : vector<1x32xf32> to vector<16x32xf32>
      %225 = arith.mulf %223, %224 : vector<16x32xf32>
      %226 = vector.broadcast %205 : vector<1x32xf32> to vector<16x32xf32>
      %227 = arith.addf %225, %226 : vector<16x32xf32>
      %c0_88 = arith.constant 0 : index
      %c0_89 = arith.constant 0 : index
      %228 = vector.load %arg20[%c0_88, %c0_89] : memref<16x32xf32, #tpu.memory_space<vmem>>, vector<16x32xf32>
      tpu.vector_store %arg20[%c0_88, %c0_89], %227 {strides = array<i32>} : memref<16x32xf32, #tpu.memory_space<vmem>>, vector<16x32xf32>,
    } else {
    }
    %c0 = arith.constant 0 : index
    %c0_1 = arith.constant 0 : index
    %3 = vector.load %arg20[%c0, %c0_1] : memref<16x32xf32, #tpu.memory_space<vmem>>, vector<16x32xf32>
    %c0_2 = arith.constant 0 : index
    %c0_3 = arith.constant 0 : index
    %c0_4 = arith.constant 0 : index
    %4 = vector.load %arg5[%c0_2, %c0_3, %c0_4] : memref<1x32x96xbf16, #tpu.memory_space<vmem>>, vector<1x32x96xbf16>
    %5 = vector.shape_cast %4 : vector<1x32x96xbf16> to vector<32x96xbf16>
    %6 = arith.truncf %3 : vector<16x32xf32> to vector<16x32xbf16>
    %cst = arith.constant dense<0.000000e+00> : vector<16x96xf32>
    %7 = tpu.matmul %6, %5, %cst {dimension_numbers = #tpu.dot_dimension_numbers<[1], [0], [0], [1], [0, 0, 1, 1], [], []>} : vector<16x32xbf16>, vector<32x96xbf16>, vector<16x96xf32> -> vector<16x96xf32>
    %c0_5 = arith.constant 0 : index
    %c0_6 = arith.constant 0 : index
    %c0_7 = arith.constant 0 : index
    %8 = vector.load %arg6[%c0_5, %c0_6, %c0_7] : memref<1x1x96xf32, #tpu.memory_space<vmem>>, vector<1x1x96xf32>
    %9 = vector.shape_cast %8 : vector<1x1x96xf32> to vector<1x96xf32>
    %10 = vector.broadcast %9 : vector<1x96xf32> to vector<16x96xf32>
    %11 = arith.addf %7, %10 : vector<16x96xf32>
    %12 = vector.extract_strided_slice %11 {offsets = [0, 0], sizes = [16, 32], strides = [1, 1]} : vector<16x96xf32> to vector<16x32xf32>
    %13 = vector.extract_strided_slice %11 {offsets = [0, 32], sizes = [16, 32], strides = [1, 1]} : vector<16x96xf32> to vector<16x32xf32>
    %14 = vector.extract_strided_slice %11 {offsets = [0, 64], sizes = [16, 32], strides = [1, 1]} : vector<16x96xf32> to vector<16x32xf32>
    %c0_8 = arith.constant 0 : index
    %c0_9 = arith.constant 0 : index
    %15 = vector.load %arg2[%c0_8, %c0_9] : memref<2x8xf32, #tpu.memory_space<vmem>>, vector<1x8xf32>
    %16 = vector.extract_strided_slice %12 {offsets = [0, 0], sizes = [8, 16], strides = [1, 1]} : vector<16x32xf32> to vector<8x16xf32>
    %17 = vector.extract_strided_slice %13 {offsets = [0, 0], sizes = [8, 16], strides = [1, 1]} : vector<16x32xf32> to vector<8x16xf32>
    %18 = vector.extract_strided_slice %14 {offsets = [0, 0], sizes = [8, 16], strides = [1, 1]} : vector<16x32xf32> to vector<8x16xf32>
    %19 = tpu.transpose %17, [1, 0] : vector<8x16xf32> -> vector<16x8xf32>
    %20 = arith.truncf %16 : vector<8x16xf32> to vector<8x16xbf16>
    %21 = arith.truncf %19 : vector<16x8xf32> to vector<16x8xbf16>
    %cst_10 = arith.constant dense<0.000000e+00> : vector<8x8xf32>
    %22 = tpu.matmul %20, %21, %cst_10 {dimension_numbers = #tpu.dot_dimension_numbers<[1], [0], [0], [1], [0, 0, 1, 1], [], []>} : vector<8x16xbf16>, vector<16x8xbf16>, vector<8x8xf32> -> vector<8x8xf32>
    %23 = vector.broadcast %15 : vector<1x8xf32> to vector<8x8xf32>
    %24 = arith.addf %22, %23 : vector<8x8xf32>
    %cst_11 = arith.constant dense<0xFF800000> : vector<8xf32>
    %25 = vector.multi_reduction <maximumf>, %24, %cst_11 [1] : vector<8x8xf32> to vector<8xf32>
    %26 = vector.shape_cast %25 : vector<8xf32> to vector<8x1xf32>
    %27 = vector.broadcast %26 : vector<8x1xf32> to vector<8x8xf32>
    %28 = arith.subf %24, %27 : vector<8x8xf32>
    %29 = math.exp %28 : vector<8x8xf32>
    %cst_12 = arith.constant dense<0.000000e+00> : vector<8xf32>
    %30 = vector.multi_reduction <add>, %29, %cst_12 [1] : vector<8x8xf32> to vector<8xf32>
    %31 = vector.shape_cast %30 : vector<8xf32> to vector<8x1xf32>
    %32 = tpu.reciprocal %31 {approx = true} : vector<8x1xf32> -> vector<8x1xf32>
    %33 = vector.broadcast %32 : vector<8x1xf32> to vector<8x8xf32>
    %34 = arith.mulf %29, %33 : vector<8x8xf32>
    %35 = arith.truncf %34 : vector<8x8xf32> to vector<8x8xbf16>
    %36 = arith.truncf %18 : vector<8x16xf32> to vector<8x16xbf16>
    %cst_13 = arith.constant dense<0.000000e+00> : vector<8x16xf32>
    %37 = tpu.matmul %35, %36, %cst_13 {dimension_numbers = #tpu.dot_dimension_numbers<[1], [0], [0], [1], [0, 0, 1, 1], [], []>} : vector<8x8xbf16>, vector<8x16xbf16>, vector<8x16xf32> -> vector<8x16xf32>
    %38 = vector.extract_strided_slice %12 {offsets = [0, 16], sizes = [8, 16], strides = [1, 1]} : vector<16x32xf32> to vector<8x16xf32>
    %39 = vector.extract_strided_slice %13 {offsets = [0, 16], sizes = [8, 16], strides = [1, 1]} : vector<16x32xf32> to vector<8x16xf32>
    %40 = vector.extract_strided_slice %14 {offsets = [0, 16], sizes = [8, 16], strides = [1, 1]} : vector<16x32xf32> to vector<8x16xf32>
    %41 = tpu.transpose %39, [1, 0] : vector<8x16xf32> -> vector<16x8xf32>
    %42 = arith.truncf %38 : vector<8x16xf32> to vector<8x16xbf16>
    %43 = arith.truncf %41 : vector<16x8xf32> to vector<16x8xbf16>
    %cst_14 = arith.constant dense<0.000000e+00> : vector<8x8xf32>
    %44 = tpu.matmul %42, %43, %cst_14 {dimension_numbers = #tpu.dot_dimension_numbers<[1], [0], [0], [1], [0, 0, 1, 1], [], []>} : vector<8x16xbf16>, vector<16x8xbf16>, vector<8x8xf32> -> vector<8x8xf32>
    %45 = vector.broadcast %15 : vector<1x8xf32> to vector<8x8xf32>
    %46 = arith.addf %44, %45 : vector<8x8xf32>
    %cst_15 = arith.constant dense<0xFF800000> : vector<8xf32>
    %47 = vector.multi_reduction <maximumf>, %46, %cst_15 [1] : vector<8x8xf32> to vector<8xf32>
    %48 = vector.shape_cast %47 : vector<8xf32> to vector<8x1xf32>
    %49 = vector.broadcast %48 : vector<8x1xf32> to vector<8x8xf32>
    %50 = arith.subf %46, %49 : vector<8x8xf32>
    %51 = math.exp %50 : vector<8x8xf32>
    %cst_16 = arith.constant dense<0.000000e+00> : vector<8xf32>
    %52 = vector.multi_reduction <add>, %51, %cst_16 [1] : vector<8x8xf32> to vector<8xf32>
    %53 = vector.shape_cast %52 : vector<8xf32> to vector<8x1xf32>
    %54 = tpu.reciprocal %53 {approx = true} : vector<8x1xf32> -> vector<8x1xf32>
    %55 = vector.broadcast %54 : vector<8x1xf32> to vector<8x8xf32>
    %56 = arith.mulf %51, %55 : vector<8x8xf32>
    %57 = arith.truncf %56 : vector<8x8xf32> to vector<8x8xbf16>
    %58 = arith.truncf %40 : vector<8x16xf32> to vector<8x16xbf16>
    %cst_17 = arith.constant dense<0.000000e+00> : vector<8x16xf32>
    %59 = tpu.matmul %57, %58, %cst_17 {dimension_numbers = #tpu.dot_dimension_numbers<[1], [0], [0], [1], [0, 0, 1, 1], [], []>} : vector<8x8xbf16>, vector<8x16xbf16>, vector<8x16xf32> -> vector<8x16xf32>
    %60 = tpu.concatenate %37, %59 in 1 : vector<8x16xf32>, vector<8x16xf32> -> vector<8x32xf32>
    %c1 = arith.constant 1 : index
    %c0_18 = arith.constant 0 : index
    %61 = vector.load %arg2[%c1, %c0_18] : memref<2x8xf32, #tpu.memory_space<vmem>>, vector<1x8xf32>
    %62 = vector.extract_strided_slice %12 {offsets = [8, 0], sizes = [8, 16], strides = [1, 1]} : vector<16x32xf32> to vector<8x16xf32>
    %63 = vector.extract_strided_slice %13 {offsets = [8, 0], sizes = [8, 16], strides = [1, 1]} : vector<16x32xf32> to vector<8x16xf32>
    %64 = vector.extract_strided_slice %14 {offsets = [8, 0], sizes = [8, 16], strides = [1, 1]} : vector<16x32xf32> to vector<8x16xf32>
    %65 = tpu.transpose %63, [1, 0] : vector<8x16xf32> -> vector<16x8xf32>
    %66 = arith.truncf %62 : vector<8x16xf32> to vector<8x16xbf16>
    %67 = arith.truncf %65 : vector<16x8xf32> to vector<16x8xbf16>
    %cst_19 = arith.constant dense<0.000000e+00> : vector<8x8xf32>
    %68 = tpu.matmul %66, %67, %cst_19 {dimension_numbers = #tpu.dot_dimension_numbers<[1], [0], [0], [1], [0, 0, 1, 1], [], []>} : vector<8x16xbf16>, vector<16x8xbf16>, vector<8x8xf32> -> vector<8x8xf32>
    %69 = vector.broadcast %61 : vector<1x8xf32> to vector<8x8xf32>
    %70 = arith.addf %68, %69 : vector<8x8xf32>
    %cst_20 = arith.constant dense<0xFF800000> : vector<8xf32>
    %71 = vector.multi_reduction <maximumf>, %70, %cst_20 [1] : vector<8x8xf32> to vector<8xf32>
    %72 = vector.shape_cast %71 : vector<8xf32> to vector<8x1xf32>
    %73 = vector.broadcast %72 : vector<8x1xf32> to vector<8x8xf32>
    %74 = arith.subf %70, %73 : vector<8x8xf32>
    %75 = math.exp %74 : vector<8x8xf32>
    %cst_21 = arith.constant dense<0.000000e+00> : vector<8xf32>
    %76 = vector.multi_reduction <add>, %75, %cst_21 [1] : vector<8x8xf32> to vector<8xf32>
    %77 = vector.shape_cast %76 : vector<8xf32> to vector<8x1xf32>
    %78 = tpu.reciprocal %77 {approx = true} : vector<8x1xf32> -> vector<8x1xf32>
    %79 = vector.broadcast %78 : vector<8x1xf32> to vector<8x8xf32>
    %80 = arith.mulf %75, %79 : vector<8x8xf32>
    %81 = arith.truncf %80 : vector<8x8xf32> to vector<8x8xbf16>
    %82 = arith.truncf %64 : vector<8x16xf32> to vector<8x16xbf16>
    %cst_22 = arith.constant dense<0.000000e+00> : vector<8x16xf32>
    %83 = tpu.matmul %81, %82, %cst_22 {dimension_numbers = #tpu.dot_dimension_numbers<[1], [0], [0], [1], [0, 0, 1, 1], [], []>} : vector<8x8xbf16>, vector<8x16xbf16>, vector<8x16xf32> -> vector<8x16xf32>
    %84 = vector.extract_strided_slice %12 {offsets = [8, 16], sizes = [8, 16], strides = [1, 1]} : vector<16x32xf32> to vector<8x16xf32>
    %85 = vector.extract_strided_slice %13 {offsets = [8, 16], sizes = [8, 16], strides = [1, 1]} : vector<16x32xf32> to vector<8x16xf32>
    %86 = vector.extract_strided_slice %14 {offsets = [8, 16], sizes = [8, 16], strides = [1, 1]} : vector<16x32xf32> to vector<8x16xf32>
    %87 = tpu.transpose %85, [1, 0] : vector<8x16xf32> -> vector<16x8xf32>
    %88 = arith.truncf %84 : vector<8x16xf32> to vector<8x16xbf16>
    %89 = arith.truncf %87 : vector<16x8xf32> to vector<16x8xbf16>
    %cst_23 = arith.constant dense<0.000000e+00> : vector<8x8xf32>
    %90 = tpu.matmul %88, %89, %cst_23 {dimension_numbers = #tpu.dot_dimension_numbers<[1], [0], [0], [1], [0, 0, 1, 1], [], []>} : vector<8x16xbf16>, vector<16x8xbf16>, vector<8x8xf32> -> vector<8x8xf32>
    %91 = vector.broadcast %61 : vector<1x8xf32> to vector<8x8xf32>
    %92 = arith.addf %90, %91 : vector<8x8xf32>
    %cst_24 = arith.constant dense<0xFF800000> : vector<8xf32>
    %93 = vector.multi_reduction <maximumf>, %92, %cst_24 [1] : vector<8x8xf32> to vector<8xf32>
    %94 = vector.shape_cast %93 : vector<8xf32> to vector<8x1xf32>
    %95 = vector.broadcast %94 : vector<8x1xf32> to vector<8x8xf32>
    %96 = arith.subf %92, %95 : vector<8x8xf32>
    %97 = math.exp %96 : vector<8x8xf32>
    %cst_25 = arith.constant dense<0.000000e+00> : vector<8xf32>
    %98 = vector.multi_reduction <add>, %97, %cst_25 [1] : vector<8x8xf32> to vector<8xf32>
    %99 = vector.shape_cast %98 : vector<8xf32> to vector<8x1xf32>
    %100 = tpu.reciprocal %99 {approx = true} : vector<8x1xf32> -> vector<8x1xf32>
    %101 = vector.broadcast %100 : vector<8x1xf32> to vector<8x8xf32>
    %102 = arith.mulf %97, %101 : vector<8x8xf32>
    %103 = arith.truncf %102 : vector<8x8xf32> to vector<8x8xbf16>
    %104 = arith.truncf %86 : vector<8x16xf32> to vector<8x16xbf16>
    %cst_26 = arith.constant dense<0.000000e+00> : vector<8x16xf32>
    %105 = tpu.matmul %103, %104, %cst_26 {dimension_numbers = #tpu.dot_dimension_numbers<[1], [0], [0], [1], [0, 0, 1, 1], [], []>} : vector<8x8xbf16>, vector<8x16xbf16>, vector<8x16xf32> -> vector<8x16xf32>
    %106 = tpu.concatenate %83, %105 in 1 : vector<8x16xf32>, vector<8x16xf32> -> vector<8x32xf32>
    %107 = tpu.concatenate %60, %106 in 0 : vector<8x32xf32>, vector<8x32xf32> -> vector<16x32xf32>
    %c0_27 = arith.constant 0 : index
    %c0_28 = arith.constant 0 : index
    %c0_29 = arith.constant 0 : index
    %108 = vector.load %arg7[%c0_27, %c0_28, %c0_29] : memref<1x32x32xbf16, #tpu.memory_space<vmem>>, vector<1x32x32xbf16>
    %109 = vector.shape_cast %108 : vector<1x32x32xbf16> to vector<32x32xbf16>
    %110 = arith.truncf %107 : vector<16x32xf32> to vector<16x32xbf16>
    %cst_30 = arith.constant dense<0.000000e+00> : vector<16x32xf32>
    %111 = tpu.matmul %110, %109, %cst_30 {dimension_numbers = #tpu.dot_dimension_numbers<[1], [0], [0], [1], [0, 0, 1, 1], [], []>} : vector<16x32xbf16>, vector<32x32xbf16>, vector<16x32xf32> -> vector<16x32xf32>
    %c0_31 = arith.constant 0 : index
    %c0_32 = arith.constant 0 : index
    %c0_33 = arith.constant 0 : index
    %112 = vector.load %arg8[%c0_31, %c0_32, %c0_33] : memref<1x1x32xf32, #tpu.memory_space<vmem>>, vector<1x1x32xf32>
    %113 = vector.shape_cast %112 : vector<1x1x32xf32> to vector<1x32xf32>
    %114 = vector.broadcast %113 : vector<1x32xf32> to vector<16x32xf32>
    %115 = arith.addf %111, %114 : vector<16x32xf32>
    %116 = arith.addf %115, %3 : vector<16x32xf32>
    %c0_34 = arith.constant 0 : index
    %c0_35 = arith.constant 0 : index
    %c0_36 = arith.constant 0 : index
    %117 = vector.load %arg9[%c0_34, %c0_35, %c0_36] : memref<1x1x32xf32, #tpu.memory_space<vmem>>, vector<1x1x32xf32>
    %118 = vector.shape_cast %117 : vector<1x1x32xf32> to vector<1x32xf32>
    %c0_37 = arith.constant 0 : index
    %c0_38 = arith.constant 0 : index
    %c0_39 = arith.constant 0 : index
    %119 = vector.load %arg10[%c0_37, %c0_38, %c0_39] : memref<1x1x32xf32, #tpu.memory_space<vmem>>, vector<1x1x32xf32>
    %120 = vector.shape_cast %119 : vector<1x1x32xf32> to vector<1x32xf32>
    %cst_40 = arith.constant dense<0.000000e+00> : vector<16xf32>
    %121 = vector.multi_reduction <add>, %116, %cst_40 [1] : vector<16x32xf32> to vector<16xf32>
    %122 = vector.shape_cast %121 : vector<16xf32> to vector<16x1xf32>
    %cst_41 = arith.constant 3.200000e+01 : f32
    %123 = vector.broadcast %cst_41 : f32 to vector<16x1xf32>
    %124 = arith.divf %122, %123 : vector<16x1xf32>
    %125 = vector.broadcast %124 : vector<16x1xf32> to vector<16x32xf32>
    %126 = arith.subf %116, %125 : vector<16x32xf32>
    %127 = arith.mulf %126, %126 : vector<16x32xf32>
    %cst_42 = arith.constant dense<0.000000e+00> : vector<16xf32>
    %128 = vector.multi_reduction <add>, %127, %cst_42 [1] : vector<16x32xf32> to vector<16xf32>
    %129 = vector.shape_cast %128 : vector<16xf32> to vector<16x1xf32>
    %cst_43 = arith.constant 3.200000e+01 : f32
    %130 = vector.broadcast %cst_43 : f32 to vector<16x1xf32>
    %131 = arith.divf %129, %130 : vector<16x1xf32>
    %132 = vector.broadcast %124 : vector<16x1xf32> to vector<16x32xf32>
    %133 = arith.subf %116, %132 : vector<16x32xf32>
    %cst_44 = arith.constant 9.99999974E-6 : f32
    %134 = vector.broadcast %cst_44 : f32 to vector<16x1xf32>
    %135 = arith.addf %131, %134 : vector<16x1xf32>
    %136 = math.rsqrt %135 : vector<16x1xf32>
    %137 = vector.broadcast %136 : vector<16x1xf32> to vector<16x32xf32>
    %138 = arith.mulf %133, %137 : vector<16x32xf32>
    %139 = vector.broadcast %118 : vector<1x32xf32> to vector<16x32xf32>
    %140 = arith.mulf %138, %139 : vector<16x32xf32>
    %141 = vector.broadcast %120 : vector<1x32xf32> to vector<16x32xf32>
    %142 = arith.addf %140, %141 : vector<16x32xf32>
    %c0_45 = arith.constant 0 : index
    %c0_46 = arith.constant 0 : index
    %c0_47 = arith.constant 0 : index
    %143 = vector.load %arg11[%c0_45, %c0_46, %c0_47] : memref<1x32x64xbf16, #tpu.memory_space<vmem>>, vector<1x32x64xbf16>
    %144 = vector.shape_cast %143 : vector<1x32x64xbf16> to vector<32x64xbf16>
    %145 = arith.truncf %142 : vector<16x32xf32> to vector<16x32xbf16>
    %cst_48 = arith.constant dense<0.000000e+00> : vector<16x64xf32>
    %146 = tpu.matmul %145, %144, %cst_48 {dimension_numbers = #tpu.dot_dimension_numbers<[1], [0], [0], [1], [0, 0, 1, 1], [], []>} : vector<16x32xbf16>, vector<32x64xbf16>, vector<16x64xf32> -> vector<16x64xf32>
    %c0_49 = arith.constant 0 : index
    %c0_50 = arith.constant 0 : index
    %c0_51 = arith.constant 0 : index
    %147 = vector.load %arg12[%c0_49, %c0_50, %c0_51] : memref<1x1x64xf32, #tpu.memory_space<vmem>>, vector<1x1x64xf32>
    %148 = vector.shape_cast %147 : vector<1x1x64xf32> to vector<1x64xf32>
    %149 = vector.broadcast %148 : vector<1x64xf32> to vector<16x64xf32>
    %150 = arith.addf %146, %149 : vector<16x64xf32>
    %151 = arith.mulf %150, %150 : vector<16x64xf32>
    %152 = arith.mulf %150, %151 : vector<16x64xf32>
    %cst_52 = arith.constant 4.471500e-02 : f32
    %153 = vector.broadcast %cst_52 : f32 to vector<16x64xf32>
    %154 = arith.mulf %153, %152 : vector<16x64xf32>
    %155 = arith.addf %150, %154 : vector<16x64xf32>
    %cst_53 = arith.constant 0.797884583 : f32
    %156 = vector.broadcast %cst_53 : f32 to vector<16x64xf32>
    %157 = arith.mulf %156, %155 : vector<16x64xf32>
    %158 = math.tanh %157 : vector<16x64xf32>
    %cst_54 = arith.constant 1.000000e+00 : f32
    %159 = vector.broadcast %cst_54 : f32 to vector<16x64xf32>
    %160 = arith.addf %159, %158 : vector<16x64xf32>
    %cst_55 = arith.constant 5.000000e-01 : f32
    %161 = vector.broadcast %cst_55 : f32 to vector<16x64xf32>
    %162 = arith.mulf %161, %160 : vector<16x64xf32>
    %163 = arith.mulf %150, %162 : vector<16x64xf32>
    %c0_56 = arith.constant 0 : index
    %c0_57 = arith.constant 0 : index
    %c0_58 = arith.constant 0 : index
    %164 = vector.load %arg13[%c0_56, %c0_57, %c0_58] : memref<1x64x32xbf16, #tpu.memory_space<vmem>>, vector<1x64x32xbf16>
    %165 = vector.shape_cast %164 : vector<1x64x32xbf16> to vector<64x32xbf16>
    %166 = arith.truncf %163 : vector<16x64xf32> to vector<16x64xbf16>
    %cst_59 = arith.constant dense<0.000000e+00> : vector<16x32xf32>
    %167 = tpu.matmul %166, %165, %cst_59 {dimension_numbers = #tpu.dot_dimension_numbers<[1], [0], [0], [1], [0, 0, 1, 1], [], []>} : vector<16x64xbf16>, vector<64x32xbf16>, vector<16x32xf32> -> vector<16x32xf32>
    %c0_60 = arith.constant 0 : index
    %c0_61 = arith.constant 0 : index
    %c0_62 = arith.constant 0 : index
    %168 = vector.load %arg14[%c0_60, %c0_61, %c0_62] : memref<1x1x32xf32, #tpu.memory_space<vmem>>, vector<1x1x32xf32>
    %169 = vector.shape_cast %168 : vector<1x1x32xf32> to vector<1x32xf32>
    %170 = vector.broadcast %169 : vector<1x32xf32> to vector<16x32xf32>
    %171 = arith.addf %167, %170 : vector<16x32xf32>
    %172 = arith.addf %171, %142 : vector<16x32xf32>
    %c0_63 = arith.constant 0 : index
    %c0_64 = arith.constant 0 : index
    %c0_65 = arith.constant 0 : index
    %173 = vector.load %arg15[%c0_63, %c0_64, %c0_65] : memref<1x1x32xf32, #tpu.memory_space<vmem>>, vector<1x1x32xf32>
    %174 = vector.shape_cast %173 : vector<1x1x32xf32> to vector<1x32xf32>
    %c0_66 = arith.constant 0 : index
    %c0_67 = arith.constant 0 : index
    %c0_68 = arith.constant 0 : index
    %175 = vector.load %arg16[%c0_66, %c0_67, %c0_68] : memref<1x1x32xf32, #tpu.memory_space<vmem>>, vector<1x1x32xf32>
    %176 = vector.shape_cast %175 : vector<1x1x32xf32> to vector<1x32xf32>
    %cst_69 = arith.constant dense<0.000000e+00> : vector<16xf32>
    %177 = vector.multi_reduction <add>, %172, %cst_69 [1] : vector<16x32xf32> to vector<16xf32>
    %178 = vector.shape_cast %177 : vector<16xf32> to vector<16x1xf32>
    %cst_70 = arith.constant 3.200000e+01 : f32
    %179 = vector.broadcast %cst_70 : f32 to vector<16x1xf32>
    %180 = arith.divf %178, %179 : vector<16x1xf32>
    %181 = vector.broadcast %180 : vector<16x1xf32> to vector<16x32xf32>
    %182 = arith.subf %172, %181 : vector<16x32xf32>
    %183 = arith.mulf %182, %182 : vector<16x32xf32>
    %cst_71 = arith.constant dense<0.000000e+00> : vector<16xf32>
    %184 = vector.multi_reduction <add>, %183, %cst_71 [1] : vector<16x32xf32> to vector<16xf32>
    %185 = vector.shape_cast %184 : vector<16xf32> to vector<16x1xf32>
    %cst_72 = arith.constant 3.200000e+01 : f32
    %186 = vector.broadcast %cst_72 : f32 to vector<16x1xf32>
    %187 = arith.divf %185, %186 : vector<16x1xf32>
    %188 = vector.broadcast %180 : vector<16x1xf32> to vector<16x32xf32>
    %189 = arith.subf %172, %188 : vector<16x32xf32>
    %cst_73 = arith.constant 9.99999974E-6 : f32
    %190 = vector.broadcast %cst_73 : f32 to vector<16x1xf32>
    %191 = arith.addf %187, %190 : vector<16x1xf32>
    %192 = math.rsqrt %191 : vector<16x1xf32>
    %193 = vector.broadcast %192 : vector<16x1xf32> to vector<16x32xf32>
    %194 = arith.mulf %189, %193 : vector<16x32xf32>
    %195 = vector.broadcast %174 : vector<1x32xf32> to vector<16x32xf32>
    %196 = arith.mulf %194, %195 : vector<16x32xf32>
    %197 = vector.broadcast %176 : vector<1x32xf32> to vector<16x32xf32>
    %198 = arith.addf %196, %197 : vector<16x32xf32>
    %c0_74 = arith.constant 0 : index
    %c0_75 = arith.constant 0 : index
    %199 = vector.load %arg20[%c0_74, %c0_75] : memref<16x32xf32, #tpu.memory_space<vmem>>, vector<16x32xf32>
    tpu.vector_store %arg20[%c0_74, %c0_75], %198 {strides = array<i32>} : memref<16x32xf32, #tpu.memory_space<vmem>>, vector<16x32xf32>,
    %c1_i32 = arith.constant 1 : i32
    %200 = arith.cmpi eq, %arg0, %c1_i32 : i32
    %201 = arith.extui %200 : i1 to i32
    %c0_i32_76 = arith.constant 0 : i32
    %202 = arith.cmpi ne, %201, %c0_i32_76 : i32
    scf.if %202 {
      %203 = vector.extract_strided_slice %198 {offsets = [0, 0], sizes = [1, 32], strides = [1, 1]} : vector<16x32xf32> to vector<1x32xf32>
      %204 = vector.extract_strided_slice %198 {offsets = [8, 0], sizes = [1, 32], strides = [1, 1]} : vector<16x32xf32> to vector<1x32xf32>
      %205 = tpu.concatenate %203, %204 in 0 : vector<1x32xf32>, vector<1x32xf32> -> vector<2x32xf32>
      %c0_77 = arith.constant 0 : index
      %c0_78 = arith.constant 0 : index
      %206 = vector.load %arg17[%c0_77, %c0_78] : memref<32x32xbf16, #tpu.memory_space<vmem>>, vector<32x32xbf16>
      %207 = arith.truncf %205 : vector<2x32xf32> to vector<2x32xbf16>
      %cst_79 = arith.constant dense<0.000000e+00> : vector<2x32xf32>
      %208 = tpu.matmul %207, %206, %cst_79 {dimension_numbers = #tpu.dot_dimension_numbers<[1], [0], [0], [1], [0, 0, 1, 1], [], []>} : vector<2x32xbf16>, vector<32x32xbf16>, vector<2x32xf32> -> vector<2x32xf32>
      %c0_80 = arith.constant 0 : index
      %c0_81 = arith.constant 0 : index
      %209 = vector.load %arg18[%c0_80, %c0_81] : memref<1x32xf32, #tpu.memory_space<vmem>>, vector<1x32xf32>
      %210 = vector.broadcast %209 : vector<1x32xf32> to vector<2x32xf32>
      %211 = arith.addf %208, %210 : vector<2x32xf32>
      %212 = math.tanh %211 : vector<2x32xf32>
      %213 = arith.mulf %212, %212 : vector<2x32xf32>
      %cst_82 = arith.constant dense<0.000000e+00> : vector<2xf32>
      %214 = vector.multi_reduction <add>, %213, %cst_82 [1] : vector<2x32xf32> to vector<2xf32>
      %215 = vector.shape_cast %214 : vector<2xf32> to vector<2x1xf32>
      %216 = math.sqrt %215 : vector<2x1xf32>
      %cst_83 = arith.constant 9.99999996E-13 : f32
      %217 = vector.broadcast %cst_83 : f32 to vector<2x1xf32>
      %218 = arith.maximumf %216, %217 : vector<2x1xf32>
      %219 = vector.broadcast %218 : vector<2x1xf32> to vector<2x32xf32>
      %220 = arith.divf %212, %219 : vector<2x32xf32>
      %c0_84 = arith.constant 0 : index
      %c0_85 = arith.constant 0 : index
      %221 = vector.load %arg19[%c0_84, %c0_85] : memref<2x32xf32, #tpu.memory_space<vmem>>, vector<2x32xf32>
      tpu.vector_store %arg19[%c0_84, %c0_85], %220 {strides = array<i32>} : memref<2x32xf32, #tpu.memory_space<vmem>>, vector<2x32xf32>,
    } else {
    }
    return
  }
  func.func @transform_0(%arg0: i32) -> (i32, i32) {
    %c0_i32 = arith.constant 0 : i32
    %c0_i32_0 = arith.constant 0 : i32
    %c0_i32_1 = arith.constant 0 : i32
    return %c0_i32, %c0_i32_0 : i32, i32
  }
  func.func @transform_1(%arg0: i32) -> (i32, i32) {
    %c0_i32 = arith.constant 0 : i32
    %c0_i32_0 = arith.constant 0 : i32
    %c0_i32_1 = arith.constant 0 : i32
    return %c0_i32, %c0_i32_0 : i32, i32
  }
  func.func @transform_2(%arg0: i32) -> (i32, i32) {
    %c0_i32 = arith.constant 0 : i32
    %c0_i32_0 = arith.constant 0 : i32
    %c0_i32_1 = arith.constant 0 : i32
    return %c0_i32, %c0_i32_0 : i32, i32
  }
  func.func @transform_3(%arg0: i32) -> (i32, i32) {
    %c0_i32 = arith.constant 0 : i32
    %c0_i32_0 = arith.constant 0 : i32
    %c0_i32_1 = arith.constant 0 : i32
    return %c0_i32, %c0_i32_0 : i32, i32
  }
  func.func @transform_4(%arg0: i32) -> (i32, i32, i32) {
    %c0_i32 = arith.constant 0 : i32
    %c0_i32_0 = arith.constant 0 : i32
    %c0_i32_1 = arith.constant 0 : i32
    return %arg0, %c0_i32, %c0_i32_0 : i32, i32, i32
  }
  func.func @transform_5(%arg0: i32) -> (i32, i32, i32) {
    %c0_i32 = arith.constant 0 : i32
    %c0_i32_0 = arith.constant 0 : i32
    %c0_i32_1 = arith.constant 0 : i32
    return %arg0, %c0_i32, %c0_i32_0 : i32, i32, i32
  }
  func.func @transform_6(%arg0: i32) -> (i32, i32, i32) {
    %c0_i32 = arith.constant 0 : i32
    %c0_i32_0 = arith.constant 0 : i32
    %c0_i32_1 = arith.constant 0 : i32
    return %arg0, %c0_i32, %c0_i32_0 : i32, i32, i32
  }
  func.func @transform_7(%arg0: i32) -> (i32, i32, i32) {
    %c0_i32 = arith.constant 0 : i32
    %c0_i32_0 = arith.constant 0 : i32
    %c0_i32_1 = arith.constant 0 : i32
    return %arg0, %c0_i32, %c0_i32_0 : i32, i32, i32
  }
  func.func @transform_8(%arg0: i32) -> (i32, i32, i32) {
    %c0_i32 = arith.constant 0 : i32
    %c0_i32_0 = arith.constant 0 : i32
    %c0_i32_1 = arith.constant 0 : i32
    return %arg0, %c0_i32, %c0_i32_0 : i32, i32, i32
  }
  func.func @transform_9(%arg0: i32) -> (i32, i32, i32) {
    %c0_i32 = arith.constant 0 : i32
    %c0_i32_0 = arith.constant 0 : i32
    %c0_i32_1 = arith.constant 0 : i32
    return %arg0, %c0_i32, %c0_i32_0 : i32, i32, i32
  }
  func.func @transform_10(%arg0: i32) -> (i32, i32, i32) {
    %c0_i32 = arith.constant 0 : i32
    %c0_i32_0 = arith.constant 0 : i32
    %c0_i32_1 = arith.constant 0 : i32
    return %arg0, %c0_i32, %c0_i32_0 : i32, i32, i32
  }
  func.func @transform_11(%arg0: i32) -> (i32, i32, i32) {
    %c0_i32 = arith.constant 0 : i32
    %c0_i32_0 = arith.constant 0 : i32
    %c0_i32_1 = arith.constant 0 : i32
    return %arg0, %c0_i32, %c0_i32_0 : i32, i32, i32
  }
  func.func @transform_12(%arg0: i32) -> (i32, i32, i32) {
    %c0_i32 = arith.constant 0 : i32
    %c0_i32_0 = arith.constant 0 : i32
    %c0_i32_1 = arith.constant 0 : i32
    return %arg0, %c0_i32, %c0_i32_0 : i32, i32, i32
  }
  func.func @transform_13(%arg0: i32) -> (i32, i32, i32) {
    %c0_i32 = arith.constant 0 : i32
    %c0_i32_0 = arith.constant 0 : i32
    %c0_i32_1 = arith.constant 0 : i32
    return %arg0, %c0_i32, %c0_i32_0 : i32, i32, i32
  }
  func.func @transform_14(%arg0: i32) -> (i32, i32, i32) {
    %c0_i32 = arith.constant 0 : i32
    %c0_i32_0 = arith.constant 0 : i32
    %c0_i32_1 = arith.constant 0 : i32
    return %arg0, %c0_i32, %c0_i32_0 : i32, i32, i32
  }
  func.func @transform_15(%arg0: i32) -> (i32, i32, i32) {
    %c0_i32 = arith.constant 0 : i32
    %c0_i32_0 = arith.constant 0 : i32
    %c0_i32_1 = arith.constant 0 : i32
    return %arg0, %c0_i32, %c0_i32_0 : i32, i32, i32
  }
  func.func @transform_16(%arg0: i32) -> (i32, i32) {
    %c0_i32 = arith.constant 0 : i32
    %c0_i32_0 = arith.constant 0 : i32
    %c0_i32_1 = arith.constant 0 : i32
    return %c0_i32, %c0_i32_0 : i32, i32
  }
  func.func @transform_17(%arg0: i32) -> (i32, i32) {
    %c0_i32 = arith.constant 0 : i32
    %c0_i32_0 = arith.constant 0 : i32
    %c0_i32_1 = arith.constant 0 : i32
    return %c0_i32, %c0_i32_0 : i32, i32
  }
  func.func @transform_18(%arg0: i32) -> (i32, i32) {
    %c0_i32 = arith.constant 0 : i32
    %c0_i32_0 = arith.constant 0 : i32
    %c0_i32_1 = arith.constant 0 : i32
    return %c0_i32, %c0_i32_0 : i32, i32
  }
}

</mosaic_0001>

<bundles_post_ra>
// kernel: codebert_forward.1
= control target key start
LH: loop header
LB: loop body
LE: loop exit
PB: predicated region body
PF: predicated region fallthrough
CT: control target
= control target key end

     0   :  { %s2739_s0 = inlined_call_operand.vmem [shape: f32[16,32], index: 0, kind: input, shape index: {}]   ;;  %s2740_s1 = inlined_call_operand.vmem [shape: f32[2,8], index: 1, kind: input, shape index: {}]   ;;  %s2741_s2 = inlined_call_operand.vmem [shape: f32[1,32], index: 2, kind: input, shape index: {}]   ;;  %s2742_s3 = inlined_call_operand.vmem [shape: f32[1,32], index: 3, kind: input, shape index: {}]   ;;  %s2743_s4 = inlined_call_operand.vmem [shape: bf16[2,32,96], index: 4, kind: input, shape index: {}]   ;;  %s2744_s5 = inlined_call_operand.vmem [shape: f32[2,1,96], index: 5, kind: input, shape index: {}]   ;;  %s2745_s6 = inlined_call_operand.vmem [shape: bf16[2,32,32], index: 6, kind: input, shape index: {}]   ;;  %s2746_s7 = inlined_call_operand.vmem [shape: f32[2,1,32], index: 7, kind: input, shape index: {}]   ;;  %s2747_s8 = inlined_call_operand.vmem [shape: f32[2,1,32], index: 8, kind: input, shape index: {}]   ;;  %s2748_s9 = inlined_call_operand.vmem [shape: f32[2,1,32], index: 9, kind: input, shape index: {}]   ;;  %s2749_s10 = inlined_call_operand.vmem [shape: bf16[2,32,64], index: 10, kind: input, shape index: {}]   ;;  %s2750_s11 = inlined_call_operand.vmem [shape: f32[2,1,64], index: 11, kind: input, shape index: {}]   ;;  %s2751_s12 = inlined_call_operand.vmem [shape: bf16[2,64,32], index: 12, kind: input, shape index: {}]   ;;  %s2752_s13 = inlined_call_operand.vmem [shape: f32[2,1,32], index: 13, kind: input, shape index: {}]   ;;  %s2753_s14 = inlined_call_operand.vmem [shape: f32[2,1,32], index: 14, kind: input, shape index: {}]   ;;  %s2754_s15 = inlined_call_operand.vmem [shape: f32[2,1,32], index: 15, kind: input, shape index: {}]   ;;  %s2755_s16 = inlined_call_operand.vmem [shape: bf16[32,32], index: 16, kind: input, shape index: {}]   ;;  %s2756_s17 = inlined_call_operand.vmem [shape: f32[1,32], index: 17, kind: input, shape index: {}]   ;;  %s2757_s18 = inlined_call_operand.hbm [shape: f32[2,32], index: 18, kind: output, shape index: {}]  }
   0x1   :  { %2764 = sst [smem:[#allocation8_spill]] %s2739_s0 }
   0x2   :  { %2765 = sst [smem:[#allocation9_spill]] %s2740_s1 }
   0x3   :  { %2766 = sst [smem:[#allocation10_spill]] %s2741_s2 }
   0x4   :  { %2767 = sst [smem:[#allocation11_spill]] %s2743_s4 }
   0x5   :  { %2768 = sst [smem:[#allocation12_spill]] %s2745_s6 }
   0x6   :  { %2769 = sst [smem:[#allocation13_spill]] %s2755_s16 }
   0x7   :  { %2770 = sst [smem:[#allocation14_spill]] %s2756_s17 }
   0x8   :  { %2771 = sst [smem:[#allocation15_spill]] %s2757_s18 }
   0x9   :  { %23 = vsyncpa [#allocation4], 0  ;;  %s2451_s27 = smov 0  }
   0xa LB: > { %2772 = sst [smem:[#allocation6_spill]] %s2343_s27  ;;  %s2457_s28 = sadd.s32 4294967295, %s2343_s27   ;;  %s2343_s27 = sphi %s2451_s27, %s29_s27  }
   0xb   : > { %p2033_p0 = scmp.ge.s32.totalorder %s2343_s27, 1  ;;  %p602_p1 = scmp.lt.s32.totalorder %s2343_s27, 3 }
   0xd   : > { %p603_p2 = pnand %p2033_p0, %p602_p1 }
   0xf   : > { %606 = sbr.rel (%p603_p2) target bundleno = 4008 (0xfa8), region = 92 }
  0x16   : > { %p690_p3 = scmp.lt.s32.totalorder %s2457_s28, 1  ;;  %s2773_s4 = sld [smem:[#allocation11_spill]] }
  0x17   : > { %s2774_s6 = sld [smem:[#allocation12_spill]]  ;;  %p2042_p4 = scmp.ne.s32.totalorder %s2457_s28, 0 }
  0x18   : > { %s2463_s29 = scalar_select %p690_p3, %s2457_s28, 1 }
  0x19   : > { %738 = sbr.rel (%p2042_p4) target bundleno = 350 (0x15e), region = 96  ;;  %s2776_s25 = sld [smem:[#allocation8_spill]] (!%p2042_p4)  ;;  %vm743_vm0 = vcmask (!%p2042_p4), 261120   ;;  %v2044_v23 = vld [vmem:[%s2742_s3] ss:$0 sm:$0xff] (!%p2042_p4) }
  0x1a   : > { %s2086_s30 = sshll.u32 %s2463_s29, 4  ;;  %s727_s0 = scalar_lea.vmem %s2752_s13, %s2463_s29 }
  0x1b   : > { %s730_s20 = scalar_lea.vmem %s2753_s14, %s2463_s29  ;;  %s733_s16 = scalar_lea.vmem %s2754_s15, %s2463_s29 }
  0x1c   : > { %s2473_s22 = scalar_lea.vmem %s2773_s4, %s2086_s30  ;;  %s2495_s4 = scalar_lea.vmem %s2749_s10, %s2086_s30 }
  0x1d   : > { %s2478_s24 = scalar_lea.vmem %s2774_s6, %s2086_s30  ;;  %s719_s6 = scalar_lea.vmem %s2750_s11, %s2463_s29 }
  0x1e   : > { %2775 = sst [smem:[#allocation7_spill]] %s2478_s24  ;;  %s2089_s24 = sshll.u32 %s2463_s29, 5 }
  0x1f   : > { %s2505_s27 = scalar_lea.vmem %s2751_s12, %s2089_s24  ;;  %v739_v0 = vld [vmem:[%s2776_s25] sm:$0xff] (!%p2042_p4)  ;;  %v740_v1 = vld [vmem:[%s2776_s25 + $0x8] sm:$0xff] (!%p2042_p4)  ;;  %s2777_s18 = sld [smem:[#allocation10_spill]] (!%p2042_p4) }
  0x20   : > { %v744_v2 = vsel %vm743_vm0, %v739_v0, 0.0  ;;  %v747_v3 = vsel %vm743_vm0, %v740_v1, 0.0 }
  0x21   : > { %745 = vadd.xlane.f32.xlu0 %v744_v2 }
  0x25   : > { %748 = vadd.xlane.f32.xlu0 %v747_v3  ;;  %v2043_v21 = vld [vmem:[%s2777_s18] ss:$0 sm:$0xff] }
  0xae   : > { %v746_v4 = vpop.xlane.xlu0 %745 }
  0xaf   : > { %v751_v5 = vmul.f32 0.03125, %v746_v4 }
  0xb1   : > { %v753_v6 = vsub.f32 %v739_v0, %v751_v5 }
  0xb2   : > { %v749_v7 = vpop.xlane.xlu0 %748 }
  0xb3   : > { %v752_v8 = vmul.f32 0.03125, %v749_v7  ;;  %v755_v9 = vmul.f32 %v753_v6, %v753_v6 }
  0xb5   : > { %v754_v10 = vsub.f32 %v740_v1, %v752_v8  ;;  %v757_v11 = vsel %vm743_vm0, %v755_v9, 0.0 }
  0xb6   : > { %758 = vadd.xlane.f32.xlu1 %v757_v11 }
  0xb7   : > { %v756_v12 = vmul.f32 %v754_v10, %v754_v10 }
  0xb9   : > { %v760_v13 = vsel %vm743_vm0, %v756_v12, 0.0 }
  0xba   : > { %761 = vadd.xlane.f32.xlu1 %v760_v13 }
 0x143   : > { %v759_v14 = vpop.xlane.xlu1 %758 }
 0x144   : > { %v763_v15 = vmul.f32 0.03125, %v759_v14 }
 0x146   : > { %v765_v16 = vadd.f32 1e-05, %v763_v15 }
 0x147   : > { %v762_v17 = vpop.xlane.xlu1 %761 }
 0x148   : > { %2240 = vrsqrt.f32 %v765_v16  ;;  %v764_v18 = vmul.f32 0.03125, %v762_v17 }
 0x14a   : > { %v766_v19 = vadd.f32 1e-05, %v764_v18 }
 0x14c   : > { %2242 = vrsqrt.f32 %v766_v19 }
 0x152   : > { %v2241_v20 = vpop.eup %2240 }
 0x153   : > { %v769_v22 = vmul.f32 %v2241_v20, %v753_v6 }
 0x155   : > { %v777_v24 = vmul.f32 %v2043_v21, %v769_v22 }
 0x156   : > { %v2243_v25 = vpop.eup %2242 }
 0x157   : > { %v785_v26 = vadd.f32 %v2044_v23, %v777_v24  ;;  %v770_v27 = vmul.f32 %v2243_v25, %v754_v10 }
 0x159   : > { %787 = vst.msk [vmem:[#allocation2] sm:$0xff] %vm743_vm0, %v785_v26  ;;  %v778_v28 = vmul.f32 %v2043_v21, %v770_v27 }
 0x15b   : > { %v786_v29 = vadd.f32 %v2044_v23, %v778_v28 }
 0x15d   : > { %788 = vst.msk [vmem:[#allocation2 + $0x8] sm:$0xff] %vm743_vm0, %v786_v29 }
 0x15e PF: > { %v2261_v30 = vld [vmem:[%s2473_s22] sm:$0xff]   ;;  %v2345_v31 = vmov 0.0   ;;  %v2262_v32 = vld [vmem:[%s2473_s22 + $0x8] sm:$0xff]   ;;  %vm2346_vm1 = vmmov 0   ;;  %vm815_vm2 = vcmask 261120   ;;  %s2778_s2 = scalar_lea.vmem %s2744_s5, %s2463_s29  ;;  %s2347_s23 = smov 96  }
 0x15f   : > { %2123 = vmatprep.subr.bf16.mxu0 %v2345_v31  ;;  %2131 = vmatprep.subr.bf16.mxu1 %v2345_v31  ;;  %v2045_v36 = vld [vmem:[%s2778_s2] ss:$0 sm:$0xff]  ;;  %vm903_vm3 = vcmask 130048   ;;  %s2779_s1 = sld [smem:[#allocation9_spill]]  ;;  %vm947_vm4 = vcmask 64512   ;;  %s2348_s17 = smov 80  }
 0x160   : > { %2124 = vmatpush3.bf16.msra.mxu0 %v2261_v30  ;;  %2127 = vmatprep.mubr.msk.bf16.mxu0 %vm2346_vm1, %v2345_v31  ;;  %v2544_v33 = vld [vmem:[#allocation2] sm:$0xff]  ;;  %s2349_s18 = smov 64   ;;  %s2350_s19 = smov 112   ;;  %vm966_vm5 = vcmask 1043456   ;;  %vm1690_vm6 = vcmask 523264  }
 0x161   : > { %2125 = vmatprep.subr.bf16.mxu0 %v2345_v31  ;;  %2133 = vmatprep.mubr.msk.bf16.mxu1 %vm2346_vm1, %v2345_v31  ;;  %s2351_s21 = smov 48   ;;  %s2780_s2 = sld [smem:[#allocation7_spill]] }
 0x162   : > { %s2782_s30 = scalar_lea.vmem %s2747_s8, %s2463_s29  ;;  %p2077_p5 = scmp.ne.s32.totalorder %s2457_s28, 1 }
 0x163   : > { %vm2354_vm7 = vmmov (!%p2077_p5), 0   ;;  %vm1790_vm8 = vcmask (!%p2077_p5), 1040384   ;;  %s2785_s22 = sld [smem:[#allocation14_spill]] (!%p2077_p5)  ;;  %vm1861_vm9 = vcmask (!%p2077_p5), 254976  }
 0x164   : > { %v2546_v34 = vld [vmem:[#allocation2 + $0x8] sm:$0xff]  ;;  %2126 = vmatpush3.bf16.msra.mxu0 %v2262_v32 }
 0x165   : > { %v795_v35 = vpack.c.bf16 %v2546_v34, %v2544_v33  ;;  %2155 = vmatprep.subr.bf16.mxu0 %v2345_v31  ;;  %v2572_v48 = vld [vmem:[%s2779_s1] ss:$0 sm:$0xff]  ;;  %v2054_v20 = vld [vmem:[%s2779_s1 + $0x1] ss:$0 sm:$0xff] }
 0x167   : > { %2128 = vmatmul.mubr.msk.bf16.vlgmr.msra.gmra.mrb[0].mxu0 %vm815_vm2, %v795_v35 }
 0x168   : > { %2157 = vmatprep.mubr.msk.bf16.mxu0 %vm2346_vm1, %v2345_v31 }
 0x23a   : > { %v853_v37 = vpop.f32.mrb[0].mxu0 }
 0x23b   : > { %v854_v38 = vadd.f32 %v2045_v36, %v853_v37  ;;  %v2129_v39 = vpop.f32.mrb[1].mxu0 }
 0x23c   : > { %v856_v40 = vpop.f32.mrb[2].mxu0 }
 0x23d   : > { %v857_v41 = vadd.f32 %v2045_v36, %v856_v40  ;;  %862 = vrot.lane.b32.xlu0 %v854_v38, %s2347_s23  ;;  %v2130_v42 = vpop.f32.mrb[3].mxu0  ;;  %v2562_v47 = vpack.c.bf16 %v854_v38, %v854_v38 }
 0x23f   : > { %v2582_v2 = vpack.c.bf16 %v857_v41, %v857_v41 }
 0x2af   : > { %v863_v43 = vpop.permute.xlu0 %862 }
 0x2b0   : > { %865 = vxpose.xlu0.b32.start.end [1/1] (short) (narrow) %v863_v43, 16 }
 0x2dd   : > { %1158 = vrot.lane.b32.xlu0 %v857_v41, %s2347_s23  ;;  %s2352_s23 = smov 16  }
 0x330   : > { %v881_v44 = vpop.trf.xlu0 }
 0x334   : > { %v882_v45 = vpop.trf.xlu0 }
 0x335   : > { %v898_v46 = vpack.c.bf16 %v882_v45, %v881_v44 }
 0x337   : > { %2132 = vmatpush3.bf16.msra.mxu1 %v898_v46 }
 0x338   : > { %2137 = vmatprep.subr.bf16.mxu1 %v2345_v31 }
 0x33a   : > { %2134 = vmatmul.mubr.msk.bf16.vlgmr.msra.gmra.mrb[0].mxu1 %vm903_vm3, %v2562_v47 }
 0x33b   : > { %2139 = vmatprep.mubr.msk.bf16.mxu1 %vm2346_vm1, %v2345_v31 }
 0x34f   : > { %v1159_v58 = vpop.permute.xlu0 %1158 }
 0x40d   : > { %v941_v49 = vpop.f32.mrb[0].mxu1 }
 0x40e   : > { %v942_v50 = vadd.f32 %v2572_v48, %v941_v49  ;;  %v2135_v51 = vpop.f32.mrb[1].mxu1 }
 0x40f   : > { %v944_v52 = vpop.f32.mrb[2].mxu1 }
 0x410   : > { %v2136_v53 = vpop.f32.mrb[3].mxu1  ;;  %v948_v54 = vsel %vm947_vm4, %v942_v50, -inf }
 0x411   : > { %949 = vmax.xlane.f32.xlu1 %v948_v54 }
 0x422   : > { %1010 = vrot.lane.b32.xlu1 %v854_v38, %s2348_s17 }
 0x426   : > { %1303 = vrot.lane.b32.xlu1 %v857_v41, %s2348_s17  ;;  %s2781_s17 = scalar_lea.vmem %s2746_s7, %s2463_s29 }
 0x42a   : > { %961 = vrot.lane.b32.xlu1 %v2562_v47, %s2349_s18 }
 0x42e   : > { %1046 = vrot.lane.b32.xlu1 %v2562_v47, %s2350_s19 }
 0x49e   : > { %v950_v55 = vpop.xlane.xlu1 %949 }
 0x49f   : > { %v951_v56 = vsub.f32 %v942_v50, %v950_v55 }
 0x4a1   : > { %v952_v57 = vmul.f32 1.442695, %v951_v56 }
 0x4a2   : > { %v1011_v59 = vpop.permute.xlu1 %1010 }
 0x4a3   : > { %2271 = vpow2.f32 %v952_v57  ;;  %v2244_v60 = vpack.i.bf16 %v1159_v58, %v1011_v59 }
 0x4a5   : > { %2245 = vxpose.xlu0.b32.start.end [1/1] (short) (narrow) %v2244_v60, 16 }
 0x4a6   : > { %v1304_v61 = vpop.permute.xlu1 %1303 }
 0x4aa   : > { %v962_v62 = vpop.permute.xlu1 %961 }
 0x4ab   : > { %v968_v63 = vsel %vm966_vm5, %v962_v62, 0 }
 0x4ac   : > { %2138 = vmatpush3.bf16.msra.mxu1 %v968_v63 }
 0x4ad   : > { %v2272_v0 = vpop.eup %2271  ;;  %2143 = vmatprep.subr.bf16.mxu1 %v2345_v31 }
 0x4ae   : > { %v954_v1 = vsel %vm947_vm4, %v2272_v0, 0.0  ;;  %v1047_v8 = vpop.permute.xlu1 %1046 }
 0x4af   : > { %955 = vadd.xlane.f32.xlu1 %v954_v1 }
 0x4c0   : > { %1339 = vrot.lane.b32.xlu1 %v2582_v2, %s2350_s19  ;;  %s2784_s19 = sld [smem:[#allocation13_spill]] (!%p2077_p5) }
 0x4e9   : > { %1306 = vxpose.xlu1.b32.start.end [1/1] (short) (narrow) %v1304_v61, 16 }
 0x525   : > { %v2246_v3 = vpop.trf.xlu0 }
 0x526   : > { %v2250_v4 = vunpack.i.h.bf16 %v2246_v3  ;;  %v2247_v10 = vunpack.i.l.bf16 %v2246_v3 }
 0x529   : > { %v2251_v5 = vpop.trf.xlu0 }
 0x52a   : > { %v2255_v6 = vunpack.i.h.bf16 %v2251_v5  ;;  %v2252_v11 = vunpack.i.l.bf16 %v2251_v5 }
 0x52c   : > { %v1194_v7 = vpack.c.bf16 %v2255_v6, %v2250_v4  ;;  %v1045_v14 = vpack.c.bf16 %v2252_v11, %v2247_v10 }
 0x52e   : > { %2156 = vmatpush3.bf16.msra.mxu0 %v1194_v7 }
 0x52f   : > { %2167 = vmatprep.subr.bf16.mxu0 %v2345_v31 }
 0x531   : > { %2158 = vmatmul.mubr.msk.bf16.vlgmr.msra.gmra.mrb[4].mxu0 %vm903_vm3, %v2582_v2 }
 0x532   : > { %2169 = vmatprep.mubr.msk.bf16.mxu0 %vm2346_vm1, %v2345_v31 }
 0x53c   : > { %v956_v9 = vpop.xlane.xlu1 %955 }
 0x53d   : > { %2273 = vrcp.f32 %v956_v9 }
 0x540   : > { %v1340_v16 = vpop.permute.xlu1 %1339 }
 0x547   : > { %v2274_v12 = vpop.eup %2273 }
 0x548   : > { %v958_v13 = vmul.f32 %v2274_v12, %v2272_v0 }
 0x54a   : > { %v959_v15 = vpack.c.bf16 %v958_v13, %v958_v13 }
 0x54c   : > { %2140 = vmatmul.mubr.msk.bf16.vlgmr.msra.gmra.mrb[4].mxu1 %vm947_vm4, %v959_v15  ;;  %v2263_v15 = vld [vmem:[%s2780_s2] sm:$0xff]  }
 0x54d   : > { %2144 = vmatpush3.bf16.msra.mxu1 %v1045_v14  ;;  %2145 = vmatprep.mubr.msk.bf16.mxu1 %vm2346_vm1, %v2345_v31 }
 0x54e   : > { %2149 = vmatprep.subr.bf16.mxu1 %v2345_v31 }
 0x554   : > { %2146 = vmatmul.mubr.msk.bf16.vlgmr.msra.gmra.mrb[8].mxu1 %vm903_vm3, %v1047_v8 }
 0x555   : > { %2151 = vmatprep.mubr.msk.bf16.mxu1 %vm2346_vm1, %v2345_v31 }
 0x569   : > { %v1322_v17 = vpop.trf.xlu1 }
 0x56d   : > { %v1323_v18 = vpop.trf.xlu1 }
 0x56e   : > { %v1338_v19 = vpack.c.bf16 %v1323_v18, %v1322_v17 }
 0x570   : > { %2168 = vmatpush3.bf16.msra.mxu0 %v1338_v19 }
 0x571   : > { %2179 = vmatprep.subr.bf16.mxu0 %v2345_v31 }
 0x573   : > { %2170 = vmatmul.mubr.msk.bf16.vlgmr.msra.gmra.mrb[8].mxu0 %vm903_vm3, %v1340_v16 }
 0x574   : > { %2183 = vmatprep.mubr.msk.bf16.mxu0 %vm2346_vm1, %v2345_v31  ;;  %2180 = vmatpush3.bf16.msra.mxu0 %v2263_v15  ;;  %v2269_v15 = vld [vmem:[%s2505_s27 + $0x10] sm:$0xff]  }
 0x575   : > { %2181 = vmatprep.subr.bf16.mxu0 %v2345_v31 }
 0x604   : > { %v1236_v21 = vpop.f32.mrb[4].mxu0 }
 0x605   : > { %v1237_v22 = vadd.f32 %v2054_v20, %v1236_v21  ;;  %v2159_v23 = vpop.f32.mrb[5].mxu0 }
 0x606   : > { %v1239_v24 = vpop.f32.mrb[6].mxu0 }
 0x607   : > { %v2160_v25 = vpop.f32.mrb[7].mxu0  ;;  %v1242_v26 = vsel %vm947_vm4, %v1237_v22, -inf }
 0x608   : > { %1243 = vmax.xlane.f32.xlu1 %v1242_v26 }
 0x619   : > { %1103 = vrot.lane.b32.xlu1 %v2562_v47, %s2351_s21 }
 0x61d   : > { %1396 = vrot.lane.b32.xlu1 %v2582_v2, %s2351_s21  ;;  %s2783_s21 = scalar_lea.vmem %s2748_s9, %s2463_s29 }
 0x61f   : > { %v2607_v27 = vpop.f32.mrb[4].mxu1 }
 0x620   : > { %v2141_v28 = vpop.f32.mrb[5].mxu1 }
 0x621   : > { %v1007_v29 = vpop.f32.mrb[6].mxu1 }
 0x622   : > { %v2142_v30 = vpop.f32.mrb[7].mxu1 }
 0x627   : > { %v1085_v32 = vpop.f32.mrb[8].mxu1 }
 0x628   : > { %v1086_v35 = vadd.f32 %v2572_v48, %v1085_v32  ;;  %v2147_v36 = vpop.f32.mrb[9].mxu1 }
 0x629   : > { %v1088_v37 = vpop.f32.mrb[10].mxu1 }
 0x62a   : > { %v2148_v38 = vpop.f32.mrb[11].mxu1  ;;  %v1091_v39 = vsel %vm947_vm4, %v1086_v35, -inf }
 0x62b   : > { %1092 = vmax.xlane.f32.xlu0 %v1091_v39 }
 0x646   : > { %v1378_v40 = vpop.f32.mrb[8].mxu0 }
 0x647   : > { %v1379_v41 = vadd.f32 %v2054_v20, %v1378_v40  ;;  %v2171_v42 = vpop.f32.mrb[9].mxu0  ;;  %v2264_v20 = vld [vmem:[%s2780_s2 + $0x8] sm:$0xff]   ;;  %v2059_v40 = vld [vmem:[%s2781_s17] ss:$0 sm:$0xff] }
 0x648   : > { %v1381_v43 = vpop.f32.mrb[10].mxu0  ;;  %2182 = vmatpush3.bf16.msra.mxu0 %v2264_v20 }
 0x649   : > { %v2172_v44 = vpop.f32.mrb[11].mxu0  ;;  %v1384_v45 = vsel %vm947_vm4, %v1379_v41, -inf  ;;  %2195 = vmatprep.subr.bf16.mxu0 %v2345_v31 }
 0x64a   : > { %1385 = vmax.xlane.f32.xlu0 %v1384_v45 }
 0x695   : > { %v1244_v46 = vpop.xlane.xlu1 %1243 }
 0x696   : > { %v1245_v47 = vsub.f32 %v1237_v22, %v1244_v46 }
 0x698   : > { %v1246_v49 = vmul.f32 1.442695, %v1245_v47 }
 0x699   : > { %v1104_v50 = vpop.permute.xlu1 %1103 }
 0x69a   : > { %2275 = vpow2.f32 %v1246_v49  ;;  %v1109_v48 = vsel %vm966_vm5, %v1104_v50, 0 }
 0x69b   : > { %2150 = vmatpush3.bf16.msra.mxu1 %v1109_v48 }
 0x69c   : > { %2161 = vmatprep.subr.bf16.mxu1 %v2345_v31 }
 0x69d   : > { %v1397_v9 = vpop.permute.xlu1 %1396 }
 0x69e   : > { %v1402_v11 = vsel %vm966_vm5, %v1397_v9, 0 }
 0x6a4   : > { %v2276_v51 = vpop.eup %2275 }
 0x6a5   : > { %v1248_v52 = vsel %vm947_vm4, %v2276_v51, 0.0 }
 0x6a6   : > { %1249 = vadd.xlane.f32.xlu0 %v1248_v52 }
 0x6b8   : > { %v1093_v53 = vpop.xlane.xlu0 %1092 }
 0x6b9   : > { %v1094_v54 = vsub.f32 %v1086_v35, %v1093_v53 }
 0x6bb   : > { %v1095_v55 = vmul.f32 1.442695, %v1094_v54 }
 0x6bd   : > { %2277 = vpow2.f32 %v1095_v55 }
 0x6c7   : > { %v2278_v56 = vpop.eup %2277 }
 0x6c8   : > { %v1097_v57 = vsel %vm947_vm4, %v2278_v56, 0.0 }
 0x6c9   : > { %1098 = vadd.xlane.f32.xlu0 %v1097_v57 }
 0x6d7   : > { %v1386_v58 = vpop.xlane.xlu0 %1385 }
 0x6d8   : > { %v1387_v59 = vsub.f32 %v1379_v41, %v1386_v58 }
 0x6da   : > { %v1388_v60 = vmul.f32 1.442695, %v1387_v59  ;;  %v2266_v59 = vld [vmem:[%s2495_s4 + $0x8] sm:$0xff]  }
 0x6dc   : > { %2279 = vpow2.f32 %v1388_v60 }
 0x6e6   : > { %v2280_v61 = vpop.eup %2279 }
 0x6e7   : > { %v1390_v62 = vsel %vm947_vm4, %v2280_v61, 0.0 }
 0x6e8   : > { %1391 = vadd.xlane.f32.xlu0 %v1390_v62 }
 0x6fe   : > { %1255 = vrot.lane.b32.xlu0 %v2582_v2, %s2349_s18 }
 0x733   : > { %v1250_v63 = vpop.xlane.xlu0 %1249 }
 0x756   : > { %v1099_v0 = vpop.xlane.xlu0 %1098 }
 0x757   : > { %2281 = vrcp.f32 %v1099_v0 }
 0x758   : > { %2283 = vrcp.f32 %v1250_v63 }
 0x761   : > { %v2282_v1 = vpop.eup %2281 }
 0x762   : > { %v1101_v3 = vmul.f32 %v2282_v1, %v2278_v56  ;;  %v2284_v5 = vpop.eup %2283 }
 0x763   : > { %v1252_v7 = vmul.f32 %v2284_v5, %v2276_v51  ;;  %v2063_v5 = vld [vmem:[%s2782_s30] ss:$0 sm:$0xff] }
 0x764   : > { %v1102_v4 = vpack.c.bf16 %v1101_v3, %v1101_v3 }
 0x765   : > { %v1253_v10 = vpack.c.bf16 %v1252_v7, %v1252_v7 }
 0x766   : > { %2152 = vmatmul.mubr.msk.bf16.vlgmr.msra.gmra.mrb[12].mxu1 %vm947_vm4, %v1102_v4 }
 0x767   : > { %2163 = vmatprep.mubr.msk.bf16.mxu1 %vm2346_vm1, %v2345_v31 }
 0x775   : > { %v1392_v6 = vpop.xlane.xlu0 %1391 }
 0x776   : > { %2285 = vrcp.f32 %v1392_v6 }
 0x779   : > { %v1256_v8 = vpop.permute.xlu0 %1255 }
 0x77a   : > { %v1261_v2 = vsel %vm966_vm5, %v1256_v8, 0 }
 0x77b   : > { %2162 = vmatpush3.bf16.msra.mxu1 %v1261_v2  ;;  %v2064_v2 = vld [vmem:[%s2783_s21] ss:$0 sm:$0xff] }
 0x77c   : > { %2173 = vmatprep.subr.bf16.mxu1 %v2345_v31 }
 0x77e   : > { %2164 = vmatmul.mubr.msk.bf16.vlgmr.msra.gmra.mrb[16].mxu1 %vm947_vm4, %v1253_v10 }
 0x77f   : > { %2174 = vmatpush3.bf16.msra.mxu1 %v1402_v11  ;;  %2175 = vmatprep.mubr.msk.bf16.mxu1 %vm2346_vm1, %v2345_v31 }
 0x780   : > { %v2286_v12 = vpop.eup %2285  ;;  %2187 = vmatprep.subr.bf16.mxu1 %v2345_v31 }
 0x781   : > { %v1394_v13 = vmul.f32 %v2286_v12, %v2280_v61 }
 0x783   : > { %v1395_v14 = vpack.c.bf16 %v1394_v13, %v1394_v13  ;;  %v2267_v13 = vld [vmem:[%s2505_s27] sm:$0xff]  }
 0x786   : > { %2176 = vmatmul.mubr.msk.bf16.vlgmr.msra.gmra.mrb[20].mxu1 %vm947_vm4, %v1395_v14  ;;  %v2268_v14 = vld [vmem:[%s2505_s27 + $0x8] sm:$0xff]  }
 0x787   : > { %2191 = vmatprep.mubr.msk.bf16.mxu1 %vm2346_vm1, %v2345_v31 }
 0x839   : > { %v1145_v16 = vpop.f32.mrb[12].mxu1 }
 0x83a   : > { %v2153_v17 = vpop.f32.mrb[13].mxu1 }
 0x83b   : > { %v1148_v18 = vpop.f32.mrb[14].mxu1  ;;  %v2065_v17 = vld [vmem:[%s719_s6] ss:$0 sm:$0xff] }
 0x83c   : > { %v2154_v19 = vpop.f32.mrb[15].mxu1 }
 0x851   : > { %v1297_v21 = vpop.f32.mrb[16].mxu1 }
 0x852   : > { %v2165_v22 = vpop.f32.mrb[17].mxu1 }
 0x853   : > { %v1300_v23 = vpop.f32.mrb[18].mxu1 }
 0x854   : > { %v2166_v24 = vpop.f32.mrb[19].mxu1 }
 0x859   : > { %v1438_v25 = vpop.f32.mrb[20].mxu1 }
 0x85a   : > { %v2256_v26 = vpack.i.bf16 %v1438_v25, %v1145_v16  ;;  %v2177_v28 = vpop.f32.mrb[21].mxu1  ;;  %v2270_v16 = vld [vmem:[%s2505_s27 + $0x18] sm:$0xff]  }
 0x85b   : > { %v1441_v29 = vpop.f32.mrb[22].mxu1 }
 0x85c   : > { %2257 = vrot.lane.b32.xlu1 %v2256_v26, %s2352_s23  ;;  %v2178_v30 = vpop.f32.mrb[23].mxu1 }
 0x8ce   : > { %v2258_v32 = vpop.permute.xlu1 %2257 }
 0x8cf   : > { %v2260_v35 = vunpack.i.h.bf16 %v2258_v32  ;;  %v2259_v36 = vunpack.i.l.bf16 %v2258_v32 }
 0x8d1   : > { %v1448_v37 = vsel %vm903_vm3, %v1297_v21, %v2260_v35  ;;  %v1155_v38 = vsel %vm903_vm3, %v2607_v27, %v2259_v36 }
 0x8d2   : > { %v1453_v39 = vpack.c.bf16 %v1448_v37, %v1155_v38 }
 0x8d4   : > { %2184 = vmatmul.mubr.msk.bf16.vlgmr.msra.gmra.mrb[12].mxu0 %vm815_vm2, %v1453_v39 }
 0x8d5   : > { %2203 = vmatprep.mubr.msk.bf16.mxu0 %vm2346_vm1, %v2345_v31  ;;  %2196 = vmatpush3.bf16.msra.mxu0 %v2267_v13 }
 0x8d6   : > { %2197 = vmatprep.subr.bf16.mxu0 %v2345_v31 }
 0x8d9   : > { %2198 = vmatpush3.bf16.msra.mxu0 %v2268_v14 }
 0x8da   : > { %2199 = vmatprep.subr.bf16.mxu0 %v2345_v31 }
 0x8dd   : > { %2200 = vmatpush3.bf16.msra.mxu0 %v2269_v15 }
 0x8de   : > { %2201 = vmatprep.subr.bf16.mxu0 %v2345_v31 }
 0x8e1   : > { %2202 = vmatpush3.bf16.msra.mxu0 %v2270_v16  ;;  %v2299_v16 = vld [vmem:[%s2784_s19] sm:$0xff] (!%p2077_p5)  }
 0x9a7   : > { %v1510_v41 = vpop.f32.mrb[12].mxu0 }
 0x9a8   : > { %v1511_v42 = vadd.f32 %v2059_v40, %v1510_v41  ;;  %v2185_v43 = vpop.f32.mrb[13].mxu0 }
 0x9a9   : > { %v1513_v44 = vpop.f32.mrb[14].mxu0 }
 0x9aa   : > { %v1514_v45 = vadd.f32 %v2059_v40, %v1513_v44  ;;  %v2186_v46 = vpop.f32.mrb[15].mxu0  ;;  %v1517_v47 = vadd.f32 %v1511_v42, %v2544_v33 }
 0x9ab   : > { %v2069_v46 = vld [vmem:[%s727_s0] ss:$0 sm:$0xff] }
 0x9ac   : > { %v1521_v27 = vsel %vm815_vm2, %v1517_v47, 0.0  ;;  %v1518_v49 = vadd.f32 %v1514_v45, %v2546_v34  ;;  %v2265_v34 = vld [vmem:[%s2495_s4] sm:$0xff]  }
 0x9ad   : > { %1522 = vadd.xlane.f32.xlu1 %v1521_v27  ;;  %2188 = vmatpush3.bf16.msra.mxu1 %v2265_v34 }
 0x9ae   : > { %v1524_v50 = vsel %vm815_vm2, %v1518_v49, 0.0  ;;  %2189 = vmatprep.subr.bf16.mxu1 %v2345_v31 }
 0x9af   : > { %1525 = vadd.xlane.f32.xlu0 %v1524_v50 }
 0x9b1   : > { %2190 = vmatpush3.bf16.msra.mxu1 %v2266_v59 }
 0xa3a   : > { %v1523_v48 = vpop.xlane.xlu1 %1522 }
 0xa3b   : > { %v1528_v51 = vmul.f32 0.03125, %v1523_v48 }
 0xa3c   : > { %v1526_v52 = vpop.xlane.xlu0 %1525 }
 0xa3d   : > { %v1530_v53 = vsub.f32 %v1517_v47, %v1528_v51  ;;  %v1529_v54 = vmul.f32 0.03125, %v1526_v52 }
 0xa3f   : > { %v1531_v55 = vsub.f32 %v1518_v49, %v1529_v54  ;;  %v1532_v56 = vmul.f32 %v1530_v53, %v1530_v53 }
 0xa41   : > { %v1534_v57 = vsel %vm815_vm2, %v1532_v56, 0.0  ;;  %v1533_v33 = vmul.f32 %v1531_v55, %v1531_v55 }
 0xa42   : > { %1535 = vadd.xlane.f32.xlu0 %v1534_v57 }
 0xa43   : > { %v1537_v58 = vsel %vm815_vm2, %v1533_v33, 0.0 }
 0xa46   : > { %1538 = vadd.xlane.f32.xlu0 %v1537_v58 }
 0xacf   : > { %v1536_v60 = vpop.xlane.xlu0 %1535 }
 0xad0   : > { %v1540_v61 = vmul.f32 0.03125, %v1536_v60 }
 0xad2   : > { %v1542_v62 = vadd.f32 1e-05, %v1540_v61 }
 0xad3   : > { %v1539_v63 = vpop.xlane.xlu0 %1538 }
 0xad4   : > { %2287 = vrsqrt.f32 %v1542_v62  ;;  %v1541_v0 = vmul.f32 0.03125, %v1539_v63 }
 0xad6   : > { %v1543_v1 = vadd.f32 1e-05, %v1541_v0 }
 0xad8   : > { %2289 = vrsqrt.f32 %v1543_v1 }
 0xade   : > { %v2288_v3 = vpop.eup %2287 }
 0xadf   : > { %v1546_v4 = vmul.f32 %v2288_v3, %v1530_v53 }
 0xae1   : > { %v1554_v7 = vmul.f32 %v2063_v5, %v1546_v4 }
 0xae2   : > { %v2290_v6 = vpop.eup %2289 }
 0xae3   : > { %v1547_v8 = vmul.f32 %v2290_v6, %v1531_v55  ;;  %v1562_v10 = vadd.f32 %v2064_v2, %v1554_v7 }
 0xae5   : > { %v1555_v9 = vmul.f32 %v2063_v5, %v1547_v8  ;;  %v2075_v8 = vld [vmem:[%s730_s20] ss:$0 sm:$0xff] }
 0xae7   : > { %v1563_v11 = vadd.f32 %v2064_v2, %v1555_v9 }
 0xae9   : > { %v1568_v12 = vpack.c.bf16 %v1563_v11, %v1562_v10 }
 0xaeb   : > { %2192 = vmatmul.mubr.msk.bf16.vlgmr.msra.gmra.mrb[24].mxu1 %vm815_vm2, %v1568_v12 }
 0xbbe   : > { %v1625_v18 = vpop.f32.mrb[24].mxu1 }
 0xbbf   : > { %v1626_v19 = vadd.f32 %v2065_v17, %v1625_v18  ;;  %v2193_v20 = vpop.f32.mrb[25].mxu1  ;;  %v2300_v18 = vld [vmem:[%s2784_s19 + $0x8] sm:$0xff] (!%p2077_p5)  }
 0xbc0   : > { %v1628_v21 = vpop.f32.mrb[26].mxu1 }
 0xbc1   : > { %v1632_v22 = vmul.f32 %v1626_v19, %v1626_v19  ;;  %v1629_v23 = vadd.f32 %v2065_v17, %v1628_v21  ;;  %v2194_v24 = vpop.f32.mrb[27].mxu1  ;;  %v2353_v17 = vmov (!%p2077_p5), 0.0  }
 0xbc2   : > { %2207 = vmatprep.subr.bf16.mxu0 (!%p2077_p5), %v2353_v17 }
 0xbc3   : > { %v1634_v25 = vmul.f32 %v1632_v22, %v1626_v19  ;;  %v1633_v26 = vmul.f32 %v1629_v23, %v1629_v23  ;;  %v2078_v22 = vld [vmem:[%s2785_s22] ss:$0 sm:$0xff] (!%p2077_p5) }
 0xbc5   : > { %v1636_v28 = vmul.f32 0.044715, %v1634_v25  ;;  %v1635_v29 = vmul.f32 %v1633_v26, %v1629_v23 }
 0xbc7   : > { %v1638_v30 = vadd.f32 %v1636_v28, %v1626_v19  ;;  %v1637_v31 = vmul.f32 0.044715, %v1635_v29 }
 0xbc9   : > { %v1640_v32 = vmul.f32 0.7978846, %v1638_v30  ;;  %v1639_v35 = vadd.f32 %v1637_v31, %v1629_v23 }
 0xbcb   : > { %2291 = vtanh.f32 %v1640_v32  ;;  %v1641_v36 = vmul.f32 0.7978846, %v1639_v35 }
 0xbcd   : > { %2293 = vtanh.f32 %v1641_v36 }
 0xbd5   : > { %v2292_v37 = vpop.eup %2291 }
 0xbd6   : > { %v1644_v38 = vadd.f32 1.0, %v2292_v37 }
 0xbd7   : > { %v2294_v39 = vpop.eup %2293 }
 0xbd8   : > { %v1646_v40 = vmul.f32 0.5, %v1644_v38  ;;  %v1645_v41 = vadd.f32 1.0, %v2294_v39 }
 0xbda   : > { %v1647_v42 = vmul.f32 0.5, %v1645_v41  ;;  %v1648_v43 = vmul.f32 %v1646_v40, %v1626_v19 }
 0xbdc   : > { %v1649_v44 = vmul.f32 %v1647_v42, %v1629_v23 }
 0xbde   : > { %v1658_v45 = vpack.c.bf16 %v1649_v44, %v1648_v43 }
 0xbe0   : > { %2204 = vmatmul.mubr.msk.bf16.vlgmr.msra.gmra.mrb[16].mxu0 %vm1690_vm6, %v1658_v45 }
 0xbe1   : > { %2208 = vmatpush3.bf16.msra.mxu0 (!%p2077_p5), %v2299_v16  ;;  %2211 = vmatprep.mubr.msk.bf16.mxu0 (!%p2077_p5), %vm2354_vm7, %v2353_v17 }
 0xbe2   : > { %2209 = vmatprep.subr.bf16.mxu0 (!%p2077_p5), %v2353_v17 }
 0xbe5   : > { %2210 = vmatpush3.bf16.msra.mxu0 (!%p2077_p5), %v2300_v18 }
 0xcb3   : > { %v1728_v47 = vpop.f32.mrb[16].mxu0 }
 0xcb4   : > { %v1729_v27 = vadd.f32 %v2069_v46, %v1728_v47  ;;  %v2205_v49 = vpop.f32.mrb[17].mxu0 }
 0xcb5   : > { %v1731_v50 = vpop.f32.mrb[18].mxu0 }
 0xcb6   : > { %v1732_v48 = vadd.f32 %v2069_v46, %v1731_v50  ;;  %v2206_v51 = vpop.f32.mrb[19].mxu0  ;;  %v1735_v52 = vadd.f32 %v1729_v27, %v1562_v10  ;;  %v2076_v10 = vld [vmem:[%s733_s16] ss:$0 sm:$0xff] }
 0xcb8   : > { %v1739_v53 = vsel %vm815_vm2, %v1735_v52, 0.0  ;;  %v1736_v54 = vadd.f32 %v1732_v48, %v1563_v11 }
 0xcb9   : > { %1740 = vadd.xlane.f32.xlu1 %v1739_v53 }
 0xcba   : > { %v1742_v55 = vsel %vm815_vm2, %v1736_v54, 0.0 }
 0xcbb   : > { %1743 = vadd.xlane.f32.xlu0 %v1742_v55 }
 0xd46   : > { %v1741_v56 = vpop.xlane.xlu1 %1740 }
 0xd47   : > { %v1745_v57 = vmul.f32 0.03125, %v1741_v56 }
 0xd48   : > { %v1744_v33 = vpop.xlane.xlu0 %1743 }
 0xd49   : > { %v1747_v58 = vsub.f32 %v1735_v52, %v1745_v57  ;;  %v1746_v34 = vmul.f32 0.03125, %v1744_v33 }
 0xd4b   : > { %v1748_v59 = vsub.f32 %v1736_v54, %v1746_v34  ;;  %v1749_v60 = vmul.f32 %v1747_v58, %v1747_v58 }
 0xd4d   : > { %v1751_v61 = vsel %vm815_vm2, %v1749_v60, 0.0  ;;  %v1750_v62 = vmul.f32 %v1748_v59, %v1748_v59 }
 0xd4e   : > { %1752 = vadd.xlane.f32.xlu1 %v1751_v61 }
 0xd4f   : > { %v1754_v63 = vsel %vm815_vm2, %v1750_v62, 0.0 }
 0xd50   : > { %1755 = vadd.xlane.f32.xlu0 %v1754_v63 }
 0xddb   : > { %v1753_v0 = vpop.xlane.xlu1 %1752 }
 0xddc   : > { %v1757_v1 = vmul.f32 0.03125, %v1753_v0 }
 0xddd   : > { %v1756_v3 = vpop.xlane.xlu0 %1755 }
 0xdde   : > { %v1759_v4 = vadd.f32 1e-05, %v1757_v1  ;;  %v1758_v5 = vmul.f32 0.03125, %v1756_v3 }
 0xde0   : > { %2295 = vrsqrt.f32 %v1759_v4  ;;  %v1760_v6 = vadd.f32 1e-05, %v1758_v5 }
 0xde2   : > { %2297 = vrsqrt.f32 %v1760_v6 }
 0xdea   : > { %v2296_v7 = vpop.eup %2295 }
 0xdeb   : > { %v1763_v2 = vmul.f32 %v2296_v7, %v1747_v58 }
 0xdec   : > { %v2298_v9 = vpop.eup %2297 }
 0xded   : > { %v1771_v11 = vmul.f32 %v2075_v8, %v1763_v2  ;;  %v1764_v12 = vmul.f32 %v2298_v9, %v1748_v59  ;;  %1786 = sbr.rel (%p2077_p5) target bundleno = 3977 (0xf89), region = 100 }
 0xdef   : > { %v1779_v13 = vadd.f32 %v2076_v10, %v1771_v11  ;;  %v1772_v14 = vmul.f32 %v2075_v8, %v1764_v12 }
 0xdf1   : > { %1781 = vst.msk [vmem:[#allocation2] sm:$0xff] %vm815_vm2, %v1779_v13  ;;  %v1780_v15 = vadd.f32 %v2076_v10, %v1772_v14 }
 0xdf3   : > { %1782 = vst.msk [vmem:[#allocation2 + $0x8] sm:$0xff] %vm815_vm2, %v1780_v15  ;;  %v1788_v19 = vrot.slane (!%p2077_p5), %v1780_v15, 7 }
 0xdf5   : > { %v1791_v20 = vsel %vm1790_vm8, %v1779_v13, %v1788_v19 }
 0xdf6   : > { %v1796_v21 = vpack.c.bf16 %v1791_v20, %v1791_v20 }
 0xdf8   : > { %2212 = vmatmul.mubr.msk.bf16.vlgmr.msra.gmra.mrb[0].mxu0 %vm815_vm2, %v1796_v21 }
 0xecb   : > { %v1853_v23 = vpop.f32.mrb[0].mxu0 }
 0xecc   : > { %v1854_v24 = vadd.f32 %v2078_v22, %v1853_v23  ;;  %v2213_v25 = vpop.f32.mrb[1].mxu0 }
 0xecd   : > { %v1856_v26 = vpop.f32.mrb[2].mxu0 }
 0xece   : > { %2301 = vtanh.f32 %v1854_v24  ;;  %v2214_v28 = vpop.f32.mrb[3].mxu0 }
 0xed8   : > { %v2302_v29 = vpop.eup %2301 }
 0xed9   : > { %v1860_v30 = vmul.f32 %v2302_v29, %v2302_v29 }
 0xedb   : > { %v1862_v31 = vsel %vm1861_vm9, %v1860_v30, 0.0 }
 0xedc   : > { %1863 = vadd.xlane.f32.xlu0 %v1862_v31 }
 0xf69   : > { %v1864_v32 = vpop.xlane.xlu0 %1863 }
 0xf6a   : > { %2303 = vrsqrt.f32 %v1864_v32  ;;  %vm1867_vm10 = vcmp.eq.f32.partialorder %v1864_v32, inf  ;;  %v1870_v37 = vand.u32 2147483648, %v1864_v32  ;;  %vm1869_vm11 = vcmp.eq.f32.partialorder %v1864_v32, 0.0 }
 0xf74   : > { %v2304_v35 = vpop.eup %2303 }
 0xf75   : > { %v1866_v36 = vmul.f32 %v2304_v35, %v1864_v32 }
 0xf77   : > { %v1868_v38 = vsel %vm1867_vm10, %v1864_v32, %v1866_v36 }
 0xf78   : > { %v1871_v39 = vsel %vm1869_vm11, %v1870_v37, %v1868_v38 }
 0xf79   : > { %v1872_v40 = vmax.f32 %v1871_v39, 1e-12 }
 0xf7b   : > { %2305 = vrcp.f32 %v1872_v40 }
 0xf85   : > { %v2306_v41 = vpop.eup %2305 }
 0xf86   : > { %v1874_v42 = vmul.f32 %v2306_v41, %v2302_v29 }
 0xf88   : > { %1875 = vst.msk [vmem:[#allocation3] sm:$0x3] %vm1861_vm9, %v1874_v42 }
 0xf89 PF: > { %p2219_p6 = scmp.eq.s32.totalorder %s2457_s28, 1  ;;  %s2355_s21 = smov [#allocation3]  }
 0xf8a   : > { %s1883_s2 = sshll.u32 %s2355_s21, 4  ;;  %s1884_s2 = int_to_ptr.vmem [resolvable:$true] %s1883_s2 }
 0xf8b   : > { %s2307_s23 = scalar_lea.vmem %s1884_s2, 32  ;;  %p2314_p10 = scmp.lt.s32.totalorder %s1884_s2, %s1884_s2 }
 0xf8c   : > { %p2308_p7 = scmp.ne.s32.totalorder %s1884_s2, %s2307_s23  ;;  %p2315_p11 = scmp.lt.s32.totalorder %s2307_s23, %s2307_s23 }
 0xf8e   : > { %p2309_p8 = pnand %p2308_p7, %p2219_p6  ;;  %p2316_p12 = por %p2315_p11, %p2314_p10 }
 0xf90   : > { %p2310_p9 = pneg %p2309_p8 }
 0xf92   : > { %p2317_p13 = pnand %p2316_p12, %p2310_p9 }
 0xf94   : > { %2320 = shalt.err (!%p2317_p13)
}
 0xf95   : > { %s2786_s0 = sld [smem:[#allocation15_spill]] }
 0xf9b   : > { %s2321_s24 = scalar_lea.hbm %s2786_s0, 32 }
 0xf9c   : > { %p2322_p0 = scmp.ne.s32.totalorder %s2786_s0, %s2321_s24  ;;  %p2327_p3 = scmp.lt.u32.totalorder %s2321_s24, %s2786_s0 }
 0xf9e   : > { %p2323_p1 = pnand %p2322_p0, %p2219_p6 }
 0xfa0   : > { %p2324_p2 = pneg %p2323_p1 }
 0xfa2   : > { %p2329_p4 = pnand %p2327_p3, %p2324_p2 }
 0xfa4   : > { %2332 = shalt.err (!%p2329_p4)
}
 0xfa5   : > { %2216 = dma.vmem_to_hbm [thread:$0]  (%p2219_p6), %s1884_s2, 32, %s2786_s0, [#allocation4]  }
 0xfa6   : > { %2338 = dma.done.wait (%p2219_p6), [#allocation4], 32  }
 0xfa7   : > { %2340 = vsyncadd (%p2219_p6), [#allocation4], 4294967264 }
 0xfa8 PF: > { %s2787_s30 = sld [smem:[#allocation6_spill]] }
 0xfae   : > { %s29_s27 = sadd.s32 1, %s2787_s30  }
 0xfaf   : > { %p26_p5 = scmp.ge.s32.totalorder %s29_s27, 4  }
 0xfb1   :  { %28 = sbr.rel (!%p26_p5) target bundleno = 10 (0xa), region = 160 }
 0xfb8   :  { %1896 = vsyncpa [#allocation4], 1 }
 0xfb9   :  { %1898 = vsyncpa [#allocation4 + $0x1], 1 }

</bundles_post_ra>
